<compile_context>
chip_gen: v7x
topology: tpu7x:2x2x1
jax: 0.10.0
libtpu: 0.0.40
codegen_flags: <defaults>
</compile_context>

<pallas_src>
import jax
import jax.numpy as jnp
from jax import lax
from jax.experimental import pallas as pl
from jax.experimental.pallas import tpu as pltpu
import numpy as np


def _pick_row_tile(total, target):
    """Largest divisor of `total` that is a multiple of 8 and <= target, else `total`."""
    for d in range(min(target, total), 7, -1):
        if total % d == 0 and d % 8 == 0:
            return d
    return total


def _mlp_residual_stats_kernel(xr_ref, xs_ref, rr_ref, rs_ref,
                               w1_ref, b1_ref, w2_ref, b2_ref,
                               zr_ref, zs_ref, str_ref, sts_ref):
    """Fused c_1 -> relu -> [c_rgb|c_sk] -> residual add, plus per-tile LN partials.

    Block shapes:
      xr_ref/xs_ref  : (1, tm, 2c)   rgb-/sk-sourced rows of cat.view(b,t,h,w,2c)
      rr_ref/rs_ref  : (1, 2, tm, c) residuals in output flat order (both halves)
      zr_ref/zs_ref  : (1, 2, tm, c) residual-added outputs
      str_ref/sts_ref: (1, 1, 2, c)  per-lane partial [sum ; sum_of_squares]
    """
    c = zr_ref.shape[-1]
    w1 = w1_ref[...]
    b1 = b1_ref[...]
    w2 = w2_ref[...]
    b2 = b2_ref[...]

    def mlp(x):
        hid = jnp.dot(x, w1, preferred_element_type=jnp.float32) + b1
        # TODO(synk): nn.Dropout(0.1) is identity in eval/inference mode; omitted.
        hid = jnp.maximum(hid, 0.0)
        return jnp.dot(hid, w2, preferred_element_type=jnp.float32) + b2

    yr = mlp(xr_ref[0])          # (tm, 2c) = [c_rgb | c_sk] for rgb-sourced rows
    ys = mlp(xs_ref[0])          # (tm, 2c) = [c_rgb | c_sk] for sk-sourced rows

    zr0 = yr[:, :c] + rr_ref[0, 0]      # z_rgb rows, first (rgb-sourced) half
    zr1 = ys[:, :c] + rr_ref[0, 1]      # z_rgb rows, second (sk-sourced) half
    zs0 = yr[:, c:] + rs_ref[0, 0]      # z_sk rows, first half
    zs1 = ys[:, c:] + rs_ref[0, 1]      # z_sk rows, second half

    zr_ref[0, 0] = zr0
    zr_ref[0, 1] = zr1
    zs_ref[0, 0] = zs0
    zs_ref[0, 1] = zs1

    # Per-lane partial statistics for the global (all-element) layer norm.
    # Combined by a tiny jnp reduction in the wrapper; keeps the grid "parallel".
    str_ref[0, 0, 0:1, :] = (jnp.sum(zr0, axis=0, keepdims=True) +
                             jnp.sum(zr1, axis=0, keepdims=True))
    str_ref[0, 0, 1:2, :] = (jnp.sum(zr0 * zr0, axis=0, keepdims=True) +
                             jnp.sum(zr1 * zr1, axis=0, keepdims=True))
    sts_ref[0, 0, 0:1, :] = (jnp.sum(zs0, axis=0, keepdims=True) +
                             jnp.sum(zs1, axis=0, keepdims=True))
    sts_ref[0, 0, 1:2, :] = (jnp.sum(zs0 * zs0, axis=0, keepdims=True) +
                             jnp.sum(zs1 * zs1, axis=0, keepdims=True))


def _normalize_kernel(p_ref, zr_ref, zs_ref, or_ref, os_ref):
    """(x - mean) * rsqrt(var + eps) for both streams; scalars live in SMEM."""
    or_ref[...] = (zr_ref[...] - p_ref[0]) * p_ref[1]
    os_ref[...] = (zs_ref[...] - p_ref[2]) * p_ref[3]


def positionwise_conv_cat(rgb_flat, sk_flat, params, *, tm=512, tnorm=1024):
    b, c, t, h, w = rgb_flat.shape
    thw = t * h * w
    # TODO(synk): odd t*h*w would make one cat-view row straddle rgb/sk memory;
    # that case would need a materialized-concat fallback (not implemented).
    assert thw % 2 == 0, "t*h*w must be even for the concat-free decomposition"
    half = thw // 2
    c2 = 2 * c
    dh = params["w1"].shape[1]
    elems = b * c * thw                       # element count of each stream

    # Free row-major reinterpretations (exactly torch's contiguous .view()s).
    xr = rgb_flat.reshape(b, half, c2)        # rgb-sourced rows of cat.view(...)
    xs = sk_flat.reshape(b, half, c2)         # sk-sourced rows
    rr = rgb_flat.reshape(b, 2, half, c)      # residuals, in output flat order
    rs = sk_flat.reshape(b, 2, half, c)

    # Merge the two second-stage projections into one matmul: W2 = [wr | ws].
    w2 = jnp.concatenate([params["wr"], params["ws"]], axis=1)   # (dh, 2c)
    b2 = jnp.concatenate([params["br"], params["bs"]], axis=1)   # (1, 2c)

    tm = _pick_row_tile(half, tm)
    n_r = half // tm
    grid = (b, n_r)

    x_spec = pl.BlockSpec((1, tm, c2), lambda bi, r: (bi, r, 0))
    res_spec = pl.BlockSpec((1, 2, tm, c), lambda bi, r: (bi, 0, r, 0))
    z_spec = pl.BlockSpec((1, 2, tm, c), lambda bi, r: (bi, 0, r, 0))
    st_spec = pl.BlockSpec((1, 1, 2, c), lambda bi, r: (bi, r, 0, 0))

    def full(arr):
        return pl.BlockSpec(arr.shape, lambda bi, r: (0, 0))

    zr, zs, st_r, st_s = pl.pallas_call(
        _mlp_residual_stats_kernel,
        out_shape=(jax.ShapeDtypeStruct((b, 2, half, c), jnp.float32),
                   jax.ShapeDtypeStruct((b, 2, half, c), jnp.float32),
                   jax.ShapeDtypeStruct((b, n_r, 2, c), jnp.float32),
                   jax.ShapeDtypeStruct((b, n_r, 2, c), jnp.float32)),
        grid=grid,
        in_specs=[x_spec, x_spec, res_spec, res_spec,
                  full(params["w1"]), full(params["b1"]), full(w2), full(b2)],
        out_specs=(z_spec, z_spec, st_spec, st_spec),
        compiler_params=pltpu.CompilerParams(
            dimension_semantics=("parallel", "parallel")),
        cost_estimate=pl.CostEstimate(
            flops=8 * b * thw * c * dh,
            transcendentals=0,
            bytes_accessed=24 * elems),
    )(xr, xs, rr, rs, params["w1"], params["b1"], w2, b2)

    # Combine per-tile partials into global LN statistics (tiny XLA reduction).
    # NOTE: E[x^2] - E[x]^2 in f32; fine at these magnitudes (validated vs ref).
    count = float(elems)

    def stats(st):
        s = jnp.sum(st[:, :, 0, :])
        q = jnp.sum(st[:, :, 1, :])
        mean = s / count
        var = jnp.maximum(q / count - mean * mean, 0.0)
        return mean, lax.rsqrt(var + 1e-5)

    mean_r, inv_r = stats(st_r)
    mean_s, inv_s = stats(st_s)
    scalars = jnp.stack([mean_r, inv_r, mean_s, inv_s]).astype(jnp.float32)

    # Tiled, lane-dense normalize pass (LN is elementwise given the scalars, so
    # a flat (rows, 128) view is legal and gives unmasked 128-lane stores).
    if elems % 128 == 0:
        rows, lanes = elems // 128, 128
    else:
        rows, lanes = b * thw, c
    zr_v = zr.reshape(rows, lanes)
    zs_v = zs.reshape(rows, lanes)
    tr = _pick_row_tile(rows, tnorm)
    row_spec = pl.BlockSpec((tr, lanes), lambda i: (i, 0))

    out_r, out_s = pl.pallas_call(
        _normalize_kernel,
        out_shape=(jax.ShapeDtypeStruct((rows, lanes), jnp.float32),
                   jax.ShapeDtypeStruct((rows, lanes), jnp.float32)),
        grid=(rows // tr,),
        in_specs=[pl.BlockSpec(memory_space=pltpu.MemorySpace.SMEM),
                  row_spec, row_spec],
        out_specs=(row_spec, row_spec),
        compiler_params=pltpu.CompilerParams(dimension_semantics=("parallel",)),
        cost_estimate=pl.CostEstimate(
            flops=4 * elems, transcendentals=0, bytes_accessed=16 * elems),
    )(scalars, zr_v, zs_v)

    # Final .view(residual.size()) is again a flat reinterpretation.
    return out_r.reshape(b, c, t, h, w), out_s.reshape(b, c, t, h, w)


def _reference(rgb, sk, p):
    """Pure-JAX reproduction of the PyTorch forward (eval mode)."""
    cat = jnp.concatenate([rgb, sk], axis=1)
    b, c2, t, h, w = cat.shape
    catv = cat.reshape(b, t, h, w, c2)                 # torch .view on contiguous
    hid = jax.nn.relu(catv @ p["w1"] + p["b1"][0])
    yr = hid @ p["wr"] + p["br"][0]
    ys = hid @ p["ws"] + p["bs"][0]
    xr = yr.reshape(rgb.shape) + rgb
    xs = ys.reshape(sk.shape) + sk

    def ln(v):
        m = jnp.mean(v)
        var = jnp.mean((v - m) ** 2)
        return (v - m) / jnp.sqrt(var + 1e-5)

    return ln(xr), ln(xs)


if __name__ == "__main__":
    d_in = 32
    rgb_hid = d_in          # required by the module's .view(residual.size())
    sk_hid = d_in
    dh = d_in // 8          # ratio = 8
    b, t, h, w = 2, 4, 8, 8

    key = jax.random.PRNGKey(0)
    ks = jax.random.split(key, 8)
    # Deterministic synthetic parameters. Weights stored as (in, out) so the
    # kernel does y = x @ W + b (equivalent to torch Linear's x @ W.T + b).
    params = {
        "w1": jax.random.normal(ks[0], (2 * d_in, dh), jnp.float32) * 0.1,
        "b1": jax.random.normal(ks[1], (1, dh), jnp.float32) * 0.1,
        "wr": jax.random.normal(ks[2], (dh, rgb_hid), jnp.float32) * 0.1,
        "br": jax.random.normal(ks[3], (1, rgb_hid), jnp.float32) * 0.1,
        "ws": jax.random.normal(ks[4], (dh, sk_hid), jnp.float32) * 0.1,
        "bs": jax.random.normal(ks[5], (1, sk_hid), jnp.float32) * 0.1,
    }
    rgb = jax.random.normal(ks[6], (b, d_in, t, h, w), jnp.float32)
    sk = jax.random.normal(ks[7], (b, d_in, t, h, w), jnp.float32)

    out_rgb, out_sk = jax.jit(positionwise_conv_cat)(rgb, sk, params)
    jax.block_until_ready((out_rgb, out_sk))

    ref_rgb, ref_sk = _reference(rgb, sk, params)
    np.testing.assert_allclose(np.asarray(out_rgb), np.asarray(ref_rgb),
                               rtol=2e-4, atol=2e-4)
    np.testing.assert_allclose(np.asarray(out_sk), np.asarray(ref_sk),
                               rtol=2e-4, atol=2e-4)
    print("KERNEL_OK")
</pallas_src>

<mosaic_0001>
module attributes {stable_mosaic.version = 11 : i64} {
  func.func @_mlp_residual_stats_kernel(%arg0: i32, %arg1: i32, %arg2: memref<1x128x64xf32, #tpu.memory_space<vmem>>, %arg3: memref<1x128x64xf32, #tpu.memory_space<vmem>>, %arg4: memref<1x2x128x32xf32, #tpu.memory_space<vmem>>, %arg5: memref<1x2x128x32xf32, #tpu.memory_space<vmem>>, %arg6: memref<64x4xf32, #tpu.memory_space<vmem>>, %arg7: memref<1x4xf32, #tpu.memory_space<vmem>>, %arg8: memref<4x64xf32, #tpu.memory_space<vmem>>, %arg9: memref<1x64xf32, #tpu.memory_space<vmem>>, %arg10: memref<1x2x128x32xf32, #tpu.memory_space<vmem>>, %arg11: memref<1x2x128x32xf32, #tpu.memory_space<vmem>>, %arg12: memref<1x1x2x32xf32, #tpu.memory_space<vmem>>, %arg13: memref<1x1x2x32xf32, #tpu.memory_space<vmem>>) attributes {dimension_semantics = [#tpu.dimension_semantics<parallel>, #tpu.dimension_semantics<parallel>], iteration_bounds = array<i64: 2, 1>, scalar_prefetch = 0 : i64, scratch_operands = 0 : i64, tpu.core_type = #tpu.core_type<tc>, window_params = [{transform_indices = @transform_0, window_bounds = array<i64: 1, 128, 64>}, {transform_indices = @transform_1, window_bounds = array<i64: 1, 128, 64>}, {transform_indices = @transform_2, window_bounds = array<i64: 1, 2, 128, 32>}, {transform_indices = @transform_3, window_bounds = array<i64: 1, 2, 128, 32>}, {pipeline_mode = #tpu.pipeline_mode<synchronous>, transform_indices = @transform_4, window_bounds = array<i64: 64, 4>}, {pipeline_mode = #tpu.pipeline_mode<synchronous>, transform_indices = @transform_5, window_bounds = array<i64: 1, 4>}, {pipeline_mode = #tpu.pipeline_mode<synchronous>, transform_indices = @transform_6, window_bounds = array<i64: 4, 64>}, {pipeline_mode = #tpu.pipeline_mode<synchronous>, transform_indices = @transform_7, window_bounds = array<i64: 1, 64>}, {transform_indices = @transform_8, window_bounds = array<i64: 1, 2, 128, 32>}, {transform_indices = @transform_9, window_bounds = array<i64: 1, 2, 128, 32>}, {transform_indices = @transform_10, window_bounds = array<i64: 1, 1, 2, 32>}, {transform_indices = @transform_11, window_bounds = array<i64: 1, 1, 2, 32>}]} {
    %c0 = arith.constant 0 : index
    %c0_0 = arith.constant 0 : index
    %0 = vector.load %arg6[%c0, %c0_0] : memref<64x4xf32, #tpu.memory_space<vmem>>, vector<64x4xf32>
    %c0_1 = arith.constant 0 : index
    %c0_2 = arith.constant 0 : index
    %1 = vector.load %arg7[%c0_1, %c0_2] : memref<1x4xf32, #tpu.memory_space<vmem>>, vector<1x4xf32>
    %c0_3 = arith.constant 0 : index
    %c0_4 = arith.constant 0 : index
    %2 = vector.load %arg8[%c0_3, %c0_4] : memref<4x64xf32, #tpu.memory_space<vmem>>, vector<4x64xf32>
    %c0_5 = arith.constant 0 : index
    %c0_6 = arith.constant 0 : index
    %3 = vector.load %arg9[%c0_5, %c0_6] : memref<1x64xf32, #tpu.memory_space<vmem>>, vector<1x64xf32>
    %c0_7 = arith.constant 0 : index
    %c0_8 = arith.constant 0 : index
    %c0_9 = arith.constant 0 : index
    %4 = vector.load %arg2[%c0_7, %c0_8, %c0_9] : memref<1x128x64xf32, #tpu.memory_space<vmem>>, vector<1x128x64xf32>
    %5 = vector.shape_cast %4 : vector<1x128x64xf32> to vector<128x64xf32>
    %cst = arith.constant dense<0.000000e+00> : vector<128x4xf32>
    %6 = tpu.matmul %5, %0, %cst {dimension_numbers = #tpu.dot_dimension_numbers<[1], [0], [0], [1], [0, 0, 1, 1], [], []>} : vector<128x64xf32>, vector<64x4xf32>, vector<128x4xf32> -> vector<128x4xf32>
    %7 = vector.broadcast %1 : vector<1x4xf32> to vector<128x4xf32>
    %8 = arith.addf %6, %7 : vector<128x4xf32>
    %cst_10 = arith.constant 0.000000e+00 : f32
    %9 = vector.broadcast %cst_10 : f32 to vector<128x4xf32>
    %10 = arith.maximumf %8, %9 : vector<128x4xf32>
    %cst_11 = arith.constant dense<0.000000e+00> : vector<128x64xf32>
    %11 = tpu.matmul %10, %2, %cst_11 {dimension_numbers = #tpu.dot_dimension_numbers<[1], [0], [0], [1], [0, 0, 1, 1], [], []>} : vector<128x4xf32>, vector<4x64xf32>, vector<128x64xf32> -> vector<128x64xf32>
    %12 = vector.broadcast %3 : vector<1x64xf32> to vector<128x64xf32>
    %13 = arith.addf %11, %12 : vector<128x64xf32>
    %c0_12 = arith.constant 0 : index
    %c0_13 = arith.constant 0 : index
    %c0_14 = arith.constant 0 : index
    %14 = vector.load %arg3[%c0_12, %c0_13, %c0_14] : memref<1x128x64xf32, #tpu.memory_space<vmem>>, vector<1x128x64xf32>
    %15 = vector.shape_cast %14 : vector<1x128x64xf32> to vector<128x64xf32>
    %cst_15 = arith.constant dense<0.000000e+00> : vector<128x4xf32>
    %16 = tpu.matmul %15, %0, %cst_15 {dimension_numbers = #tpu.dot_dimension_numbers<[1], [0], [0], [1], [0, 0, 1, 1], [], []>} : vector<128x64xf32>, vector<64x4xf32>, vector<128x4xf32> -> vector<128x4xf32>
    %17 = vector.broadcast %1 : vector<1x4xf32> to vector<128x4xf32>
    %18 = arith.addf %16, %17 : vector<128x4xf32>
    %cst_16 = arith.constant 0.000000e+00 : f32
    %19 = vector.broadcast %cst_16 : f32 to vector<128x4xf32>
    %20 = arith.maximumf %18, %19 : vector<128x4xf32>
    %cst_17 = arith.constant dense<0.000000e+00> : vector<128x64xf32>
    %21 = tpu.matmul %20, %2, %cst_17 {dimension_numbers = #tpu.dot_dimension_numbers<[1], [0], [0], [1], [0, 0, 1, 1], [], []>} : vector<128x4xf32>, vector<4x64xf32>, vector<128x64xf32> -> vector<128x64xf32>
    %22 = vector.broadcast %3 : vector<1x64xf32> to vector<128x64xf32>
    %23 = arith.addf %21, %22 : vector<128x64xf32>
    %24 = vector.extract_strided_slice %13 {offsets = [0, 0], sizes = [128, 32], strides = [1, 1]} : vector<128x64xf32> to vector<128x32xf32>
    %c0_18 = arith.constant 0 : index
    %c0_19 = arith.constant 0 : index
    %c0_20 = arith.constant 0 : index
    %c0_21 = arith.constant 0 : index
    %25 = vector.load %arg4[%c0_18, %c0_19, %c0_20, %c0_21] : memref<1x2x128x32xf32, #tpu.memory_space<vmem>>, vector<1x1x128x32xf32>
    %26 = vector.shape_cast %25 : vector<1x1x128x32xf32> to vector<128x32xf32>
    %27 = arith.addf %24, %26 : vector<128x32xf32>
    %28 = vector.extract_strided_slice %23 {offsets = [0, 0], sizes = [128, 32], strides = [1, 1]} : vector<128x64xf32> to vector<128x32xf32>
    %c0_22 = arith.constant 0 : index
    %c1 = arith.constant 1 : index
    %c0_23 = arith.constant 0 : index
    %c0_24 = arith.constant 0 : index
    %29 = vector.load %arg4[%c0_22, %c1, %c0_23, %c0_24] : memref<1x2x128x32xf32, #tpu.memory_space<vmem>>, vector<1x1x128x32xf32>
    %30 = vector.shape_cast %29 : vector<1x1x128x32xf32> to vector<128x32xf32>
    %31 = arith.addf %28, %30 : vector<128x32xf32>
    %32 = vector.extract_strided_slice %13 {offsets = [0, 32], sizes = [128, 32], strides = [1, 1]} : vector<128x64xf32> to vector<128x32xf32>
    %c0_25 = arith.constant 0 : index
    %c0_26 = arith.constant 0 : index
    %c0_27 = arith.constant 0 : index
    %c0_28 = arith.constant 0 : index
    %33 = vector.load %arg5[%c0_25, %c0_26, %c0_27, %c0_28] : memref<1x2x128x32xf32, #tpu.memory_space<vmem>>, vector<1x1x128x32xf32>
    %34 = vector.shape_cast %33 : vector<1x1x128x32xf32> to vector<128x32xf32>
    %35 = arith.addf %32, %34 : vector<128x32xf32>
    %36 = vector.extract_strided_slice %23 {offsets = [0, 32], sizes = [128, 32], strides = [1, 1]} : vector<128x64xf32> to vector<128x32xf32>
    %c0_29 = arith.constant 0 : index
    %c1_30 = arith.constant 1 : index
    %c0_31 = arith.constant 0 : index
    %c0_32 = arith.constant 0 : index
    %37 = vector.load %arg5[%c0_29, %c1_30, %c0_31, %c0_32] : memref<1x2x128x32xf32, #tpu.memory_space<vmem>>, vector<1x1x128x32xf32>
    %38 = vector.shape_cast %37 : vector<1x1x128x32xf32> to vector<128x32xf32>
    %39 = arith.addf %36, %38 : vector<128x32xf32>
    %c0_33 = arith.constant 0 : index
    %c0_34 = arith.constant 0 : index
    %c0_35 = arith.constant 0 : index
    %c0_36 = arith.constant 0 : index
    %40 = vector.load %arg10[%c0_33, %c0_34, %c0_35, %c0_36] : memref<1x2x128x32xf32, #tpu.memory_space<vmem>>, vector<1x1x128x32xf32>
    %41 = vector.shape_cast %40 : vector<1x1x128x32xf32> to vector<128x32xf32>
    %42 = vector.shape_cast %27 : vector<128x32xf32> to vector<1x1x128x32xf32>
    tpu.vector_store %arg10[%c0_33, %c0_34, %c0_35, %c0_36], %42 {strides = array<i32>} : memref<1x2x128x32xf32, #tpu.memory_space<vmem>>, vector<1x1x128x32xf32>,
    %c0_37 = arith.constant 0 : index
    %c1_38 = arith.constant 1 : index
    %c0_39 = arith.constant 0 : index
    %c0_40 = arith.constant 0 : index
    %43 = vector.load %arg10[%c0_37, %c1_38, %c0_39, %c0_40] : memref<1x2x128x32xf32, #tpu.memory_space<vmem>>, vector<1x1x128x32xf32>
    %44 = vector.shape_cast %43 : vector<1x1x128x32xf32> to vector<128x32xf32>
    %45 = vector.shape_cast %31 : vector<128x32xf32> to vector<1x1x128x32xf32>
    tpu.vector_store %arg10[%c0_37, %c1_38, %c0_39, %c0_40], %45 {strides = array<i32>} : memref<1x2x128x32xf32, #tpu.memory_space<vmem>>, vector<1x1x128x32xf32>,
    %c0_41 = arith.constant 0 : index
    %c0_42 = arith.constant 0 : index
    %c0_43 = arith.constant 0 : index
    %c0_44 = arith.constant 0 : index
    %46 = vector.load %arg11[%c0_41, %c0_42, %c0_43, %c0_44] : memref<1x2x128x32xf32, #tpu.memory_space<vmem>>, vector<1x1x128x32xf32>
    %47 = vector.shape_cast %46 : vector<1x1x128x32xf32> to vector<128x32xf32>
    %48 = vector.shape_cast %35 : vector<128x32xf32> to vector<1x1x128x32xf32>
    tpu.vector_store %arg11[%c0_41, %c0_42, %c0_43, %c0_44], %48 {strides = array<i32>} : memref<1x2x128x32xf32, #tpu.memory_space<vmem>>, vector<1x1x128x32xf32>,
    %c0_45 = arith.constant 0 : index
    %c1_46 = arith.constant 1 : index
    %c0_47 = arith.constant 0 : index
    %c0_48 = arith.constant 0 : index
    %49 = vector.load %arg11[%c0_45, %c1_46, %c0_47, %c0_48] : memref<1x2x128x32xf32, #tpu.memory_space<vmem>>, vector<1x1x128x32xf32>
    %50 = vector.shape_cast %49 : vector<1x1x128x32xf32> to vector<128x32xf32>
    %51 = vector.shape_cast %39 : vector<128x32xf32> to vector<1x1x128x32xf32>
    tpu.vector_store %arg11[%c0_45, %c1_46, %c0_47, %c0_48], %51 {strides = array<i32>} : memref<1x2x128x32xf32, #tpu.memory_space<vmem>>, vector<1x1x128x32xf32>,
    %cst_49 = arith.constant dense<0.000000e+00> : vector<32xf32>
    %52 = vector.multi_reduction <add>, %27, %cst_49 [0] : vector<128x32xf32> to vector<32xf32>
    %53 = vector.shape_cast %52 : vector<32xf32> to vector<1x32xf32>
    %cst_50 = arith.constant dense<0.000000e+00> : vector<32xf32>
    %54 = vector.multi_reduction <add>, %31, %cst_50 [0] : vector<128x32xf32> to vector<32xf32>
    %55 = vector.shape_cast %54 : vector<32xf32> to vector<1x32xf32>
    %56 = arith.addf %53, %55 : vector<1x32xf32>
    %c0_51 = arith.constant 0 : index
    %c0_52 = arith.constant 0 : index
    %c0_53 = arith.constant 0 : index
    %c0_54 = arith.constant 0 : index
    %57 = vector.load %arg12[%c0_51, %c0_52, %c0_53, %c0_54] : memref<1x1x2x32xf32, #tpu.memory_space<vmem>>, vector<1x1x1x32xf32>
    %58 = vector.shape_cast %57 : vector<1x1x1x32xf32> to vector<1x32xf32>
    %59 = vector.shape_cast %56 : vector<1x32xf32> to vector<1x1x1x32xf32>
    tpu.vector_store %arg12[%c0_51, %c0_52, %c0_53, %c0_54], %59 {strides = array<i32>} : memref<1x1x2x32xf32, #tpu.memory_space<vmem>>, vector<1x1x1x32xf32>,
    %60 = arith.mulf %27, %27 : vector<128x32xf32>
    %cst_55 = arith.constant dense<0.000000e+00> : vector<32xf32>
    %61 = vector.multi_reduction <add>, %60, %cst_55 [0] : vector<128x32xf32> to vector<32xf32>
    %62 = vector.shape_cast %61 : vector<32xf32> to vector<1x32xf32>
    %63 = arith.mulf %31, %31 : vector<128x32xf32>
    %cst_56 = arith.constant dense<0.000000e+00> : vector<32xf32>
    %64 = vector.multi_reduction <add>, %63, %cst_56 [0] : vector<128x32xf32> to vector<32xf32>
    %65 = vector.shape_cast %64 : vector<32xf32> to vector<1x32xf32>
    %66 = arith.addf %62, %65 : vector<1x32xf32>
    %c0_57 = arith.constant 0 : index
    %c0_58 = arith.constant 0 : index
    %c1_59 = arith.constant 1 : index
    %c0_60 = arith.constant 0 : index
    %67 = vector.load %arg12[%c0_57, %c0_58, %c1_59, %c0_60] : memref<1x1x2x32xf32, #tpu.memory_space<vmem>>, vector<1x1x1x32xf32>
    %68 = vector.shape_cast %67 : vector<1x1x1x32xf32> to vector<1x32xf32>
    %69 = vector.shape_cast %66 : vector<1x32xf32> to vector<1x1x1x32xf32>
    tpu.vector_store %arg12[%c0_57, %c0_58, %c1_59, %c0_60], %69 {strides = array<i32>} : memref<1x1x2x32xf32, #tpu.memory_space<vmem>>, vector<1x1x1x32xf32>,
    %cst_61 = arith.constant dense<0.000000e+00> : vector<32xf32>
    %70 = vector.multi_reduction <add>, %35, %cst_61 [0] : vector<128x32xf32> to vector<32xf32>
    %71 = vector.shape_cast %70 : vector<32xf32> to vector<1x32xf32>
    %cst_62 = arith.constant dense<0.000000e+00> : vector<32xf32>
    %72 = vector.multi_reduction <add>, %39, %cst_62 [0] : vector<128x32xf32> to vector<32xf32>
    %73 = vector.shape_cast %72 : vector<32xf32> to vector<1x32xf32>
    %74 = arith.addf %71, %73 : vector<1x32xf32>
    %c0_63 = arith.constant 0 : index
    %c0_64 = arith.constant 0 : index
    %c0_65 = arith.constant 0 : index
    %c0_66 = arith.constant 0 : index
    %75 = vector.load %arg13[%c0_63, %c0_64, %c0_65, %c0_66] : memref<1x1x2x32xf32, #tpu.memory_space<vmem>>, vector<1x1x1x32xf32>
    %76 = vector.shape_cast %75 : vector<1x1x1x32xf32> to vector<1x32xf32>
    %77 = vector.shape_cast %74 : vector<1x32xf32> to vector<1x1x1x32xf32>
    tpu.vector_store %arg13[%c0_63, %c0_64, %c0_65, %c0_66], %77 {strides = array<i32>} : memref<1x1x2x32xf32, #tpu.memory_space<vmem>>, vector<1x1x1x32xf32>,
    %78 = arith.mulf %35, %35 : vector<128x32xf32>
    %cst_67 = arith.constant dense<0.000000e+00> : vector<32xf32>
    %79 = vector.multi_reduction <add>, %78, %cst_67 [0] : vector<128x32xf32> to vector<32xf32>
    %80 = vector.shape_cast %79 : vector<32xf32> to vector<1x32xf32>
    %81 = arith.mulf %39, %39 : vector<128x32xf32>
    %cst_68 = arith.constant dense<0.000000e+00> : vector<32xf32>
    %82 = vector.multi_reduction <add>, %81, %cst_68 [0] : vector<128x32xf32> to vector<32xf32>
    %83 = vector.shape_cast %82 : vector<32xf32> to vector<1x32xf32>
    %84 = arith.addf %80, %83 : vector<1x32xf32>
    %c0_69 = arith.constant 0 : index
    %c0_70 = arith.constant 0 : index
    %c1_71 = arith.constant 1 : index
    %c0_72 = arith.constant 0 : index
    %85 = vector.load %arg13[%c0_69, %c0_70, %c1_71, %c0_72] : memref<1x1x2x32xf32, #tpu.memory_space<vmem>>, vector<1x1x1x32xf32>
    %86 = vector.shape_cast %85 : vector<1x1x1x32xf32> to vector<1x32xf32>
    %87 = vector.shape_cast %84 : vector<1x32xf32> to vector<1x1x1x32xf32>
    tpu.vector_store %arg13[%c0_69, %c0_70, %c1_71, %c0_72], %87 {strides = array<i32>} : memref<1x1x2x32xf32, #tpu.memory_space<vmem>>, vector<1x1x1x32xf32>,
    return
  }
  func.func @transform_0(%arg0: i32, %arg1: i32) -> (i32, i32, i32) {
    %c0_i32 = arith.constant 0 : i32
    %c0_i32_0 = arith.constant 0 : i32
    return %arg0, %arg1, %c0_i32 : i32, i32, i32
  }
  func.func @transform_1(%arg0: i32, %arg1: i32) -> (i32, i32, i32) {
    %c0_i32 = arith.constant 0 : i32
    %c0_i32_0 = arith.constant 0 : i32
    return %arg0, %arg1, %c0_i32 : i32, i32, i32
  }
  func.func @transform_2(%arg0: i32, %arg1: i32) -> (i32, i32, i32, i32) {
    %c0_i32 = arith.constant 0 : i32
    %c0_i32_0 = arith.constant 0 : i32
    %c0_i32_1 = arith.constant 0 : i32
    return %arg0, %c0_i32, %arg1, %c0_i32_0 : i32, i32, i32, i32
  }
  func.func @transform_3(%arg0: i32, %arg1: i32) -> (i32, i32, i32, i32) {
    %c0_i32 = arith.constant 0 : i32
    %c0_i32_0 = arith.constant 0 : i32
    %c0_i32_1 = arith.constant 0 : i32
    return %arg0, %c0_i32, %arg1, %c0_i32_0 : i32, i32, i32, i32
  }
  func.func @transform_4(%arg0: i32, %arg1: i32) -> (i32, i32) {
    %c0_i32 = arith.constant 0 : i32
    %c0_i32_0 = arith.constant 0 : i32
    %c0_i32_1 = arith.constant 0 : i32
    return %c0_i32, %c0_i32_0 : i32, i32
  }
  func.func @transform_5(%arg0: i32, %arg1: i32) -> (i32, i32) {
    %c0_i32 = arith.constant 0 : i32
    %c0_i32_0 = arith.constant 0 : i32
    %c0_i32_1 = arith.constant 0 : i32
    return %c0_i32, %c0_i32_0 : i32, i32
  }
  func.func @transform_6(%arg0: i32, %arg1: i32) -> (i32, i32) {
    %c0_i32 = arith.constant 0 : i32
    %c0_i32_0 = arith.constant 0 : i32
    %c0_i32_1 = arith.constant 0 : i32
    return %c0_i32, %c0_i32_0 : i32, i32
  }
  func.func @transform_7(%arg0: i32, %arg1: i32) -> (i32, i32) {
    %c0_i32 = arith.constant 0 : i32
    %c0_i32_0 = arith.constant 0 : i32
    %c0_i32_1 = arith.constant 0 : i32
    return %c0_i32, %c0_i32_0 : i32, i32
  }
  func.func @transform_8(%arg0: i32, %arg1: i32) -> (i32, i32, i32, i32) {
    %c0_i32 = arith.constant 0 : i32
    %c0_i32_0 = arith.constant 0 : i32
    %c0_i32_1 = arith.constant 0 : i32
    return %arg0, %c0_i32, %arg1, %c0_i32_0 : i32, i32, i32, i32
  }
  func.func @transform_9(%arg0: i32, %arg1: i32) -> (i32, i32, i32, i32) {
    %c0_i32 = arith.constant 0 : i32
    %c0_i32_0 = arith.constant 0 : i32
    %c0_i32_1 = arith.constant 0 : i32
    return %arg0, %c0_i32, %arg1, %c0_i32_0 : i32, i32, i32, i32
  }
  func.func @transform_10(%arg0: i32, %arg1: i32) -> (i32, i32, i32, i32) {
    %c0_i32 = arith.constant 0 : i32
    %c0_i32_0 = arith.constant 0 : i32
    %c0_i32_1 = arith.constant 0 : i32
    return %arg0, %arg1, %c0_i32, %c0_i32_0 : i32, i32, i32, i32
  }
  func.func @transform_11(%arg0: i32, %arg1: i32) -> (i32, i32, i32, i32) {
    %c0_i32 = arith.constant 0 : i32
    %c0_i32_0 = arith.constant 0 : i32
    %c0_i32_1 = arith.constant 0 : i32
    return %arg0, %arg1, %c0_i32, %c0_i32_0 : i32, i32, i32, i32
  }
}

module attributes {stable_mosaic.version = 11 : i64} {
  func.func @_normalize_kernel(%arg0: i32, %arg1: memref<4xf32, #tpu.memory_space<smem>>, %arg2: memref<128x128xf32, #tpu.memory_space<vmem>>, %arg3: memref<128x128xf32, #tpu.memory_space<vmem>>, %arg4: memref<128x128xf32, #tpu.memory_space<vmem>>, %arg5: memref<128x128xf32, #tpu.memory_space<vmem>>) attributes {dimension_semantics = [#tpu.dimension_semantics<parallel>], iteration_bounds = array<i64: 1>, scalar_prefetch = 0 : i64, scratch_operands = 0 : i64, tpu.core_type = #tpu.core_type<tc>, window_params = [{transform_indices = @transform_0, window_bounds = array<i64: 4>}, {transform_indices = @transform_1, window_bounds = array<i64: 128, 128>}, {transform_indices = @transform_2, window_bounds = array<i64: 128, 128>}, {transform_indices = @transform_3, window_bounds = array<i64: 128, 128>}, {transform_indices = @transform_4, window_bounds = array<i64: 128, 128>}]} {
    %c0 = arith.constant 0 : index
    %c0_0 = arith.constant 0 : index
    %0 = vector.load %arg2[%c0, %c0_0] : memref<128x128xf32, #tpu.memory_space<vmem>>, vector<128x128xf32>
    %c0_1 = arith.constant 0 : index
    %1 = memref.load %arg1[%c0_1] : memref<4xf32, #tpu.memory_space<smem>>
    %2 = vector.broadcast %1 : f32 to vector<128x128xf32>
    %3 = arith.subf %0, %2 : vector<128x128xf32>
    %c1 = arith.constant 1 : index
    %4 = memref.load %arg1[%c1] : memref<4xf32, #tpu.memory_space<smem>>
    %5 = vector.broadcast %4 : f32 to vector<128x128xf32>
    %6 = arith.mulf %3, %5 : vector<128x128xf32>
    %c0_2 = arith.constant 0 : index
    %c0_3 = arith.constant 0 : index
    %7 = vector.load %arg4[%c0_2, %c0_3] : memref<128x128xf32, #tpu.memory_space<vmem>>, vector<128x128xf32>
    tpu.vector_store %arg4[%c0_2, %c0_3], %6 {strides = array<i32>} : memref<128x128xf32, #tpu.memory_space<vmem>>, vector<128x128xf32>,
    %c0_4 = arith.constant 0 : index
    %c0_5 = arith.constant 0 : index
    %8 = vector.load %arg3[%c0_4, %c0_5] : memref<128x128xf32, #tpu.memory_space<vmem>>, vector<128x128xf32>
    %c2 = arith.constant 2 : index
    %9 = memref.load %arg1[%c2] : memref<4xf32, #tpu.memory_space<smem>>
    %10 = vector.broadcast %9 : f32 to vector<128x128xf32>
    %11 = arith.subf %8, %10 : vector<128x128xf32>
    %c3 = arith.constant 3 : index
    %12 = memref.load %arg1[%c3] : memref<4xf32, #tpu.memory_space<smem>>
    %13 = vector.broadcast %12 : f32 to vector<128x128xf32>
    %14 = arith.mulf %11, %13 : vector<128x128xf32>
    %c0_6 = arith.constant 0 : index
    %c0_7 = arith.constant 0 : index
    %15 = vector.load %arg5[%c0_6, %c0_7] : memref<128x128xf32, #tpu.memory_space<vmem>>, vector<128x128xf32>
    tpu.vector_store %arg5[%c0_6, %c0_7], %14 {strides = array<i32>} : memref<128x128xf32, #tpu.memory_space<vmem>>, vector<128x128xf32>,
    return
  }
  func.func @transform_0(%arg0: i32) -> i32 {
    %c0_i32 = arith.constant 0 : i32
    %c0_i32_0 = arith.constant 0 : i32
    return %c0_i32 : i32
  }
  func.func @transform_1(%arg0: i32) -> (i32, i32) {
    %c0_i32 = arith.constant 0 : i32
    %c0_i32_0 = arith.constant 0 : i32
    return %arg0, %c0_i32 : i32, i32
  }
  func.func @transform_2(%arg0: i32) -> (i32, i32) {
    %c0_i32 = arith.constant 0 : i32
    %c0_i32_0 = arith.constant 0 : i32
    return %arg0, %c0_i32 : i32, i32
  }
  func.func @transform_3(%arg0: i32) -> (i32, i32) {
    %c0_i32 = arith.constant 0 : i32
    %c0_i32_0 = arith.constant 0 : i32
    return %arg0, %c0_i32 : i32, i32
  }
  func.func @transform_4(%arg0: i32) -> (i32, i32) {
    %c0_i32 = arith.constant 0 : i32
    %c0_i32_0 = arith.constant 0 : i32
    return %arg0, %c0_i32 : i32, i32
  }
}

</mosaic_0001>

<bundles_post_ra>
// kernel: positionwise_conv_cat.2
= control target key start
LH: loop header
LB: loop body
LE: loop exit
PB: predicated region body
PF: predicated region fallthrough
CT: control target
= control target key end

     0   :  { %s3083_s17 = smov 0   ;;  %s3085_s18 = smov 0   ;;  %s3957_s0 = inlined_call_operand.vmem [shape: f32[2,128,64], index: 0, kind: input, shape index: {}]   ;;  %s3958_s1 = inlined_call_operand.vmem [shape: f32[2,128,64], index: 1, kind: input, shape index: {}]   ;;  %s3959_s2 = inlined_call_operand.vmem [shape: f32[2,2,128,32], index: 2, kind: input, shape index: {}]   ;;  %s3960_s3 = inlined_call_operand.vmem [shape: f32[2,2,128,32], index: 3, kind: input, shape index: {}]   ;;  %s3961_s4 = inlined_call_operand.vmem [shape: f32[64,4], index: 4, kind: input, shape index: {}]   ;;  %s3962_s5 = inlined_call_operand.vmem [shape: f32[1,4], index: 5, kind: input, shape index: {}]   ;;  %s3963_s6 = inlined_call_operand.vmem [shape: f32[4,64], index: 6, kind: input, shape index: {}]   ;;  %s3964_s7 = inlined_call_operand.vmem [shape: f32[1,64], index: 7, kind: input, shape index: {}]   ;;  %s3965_s8 = inlined_call_operand.vmem [shape: f32[2,2,128,32], index: 8, kind: output, shape index: {0}]   ;;  %s3966_s9 = inlined_call_operand.vmem [shape: f32[2,2,128,32], index: 9, kind: output, shape index: {1}]   ;;  %s3967_s10 = inlined_call_operand.vmem [shape: f32[2,1,2,32], index: 10, kind: output, shape index: {2}]   ;;  %s3968_s11 = inlined_call_operand.vmem [shape: f32[2,1,2,32], index: 11, kind: output, shape index: {3}]  }
   0x1   :  { %s3087_s19 = smov 0  }
   0x2 LB: > { %s34_s20 = sadd.s32 1, %s3015_s18  ;;  %p2567_p0 = scmp.ge.s32.totalorder %s3019_s19, 1  ;;  %s3019_s19 = sphi %s3087_s19, %s22_s19   ;;  %s3015_s18 = sphi %s3085_s18, %s3970_s18   ;;  %s3011_s17 = sphi %s3083_s17, %s3969_s17  }
   0x3   : > { %p36_p1 = scmp.ge.s32.totalorder %s34_s20, 2  ;;  %p422_p2 = scmp.lt.s32.totalorder %s3019_s19, 3 }
   0x5   : > { %s3972_s20 = smov (%p36_p1, %s34_s20), 0  ;;  %p423_p3 = pnand %p2567_p0, %p422_p2 }
   0x6   : > { %v594_v0 = vld [vmem:[%s3961_s4] sm:$0xff] (!%p423_p3)  ;;  %v595_v1 = vld [vmem:[%s3961_s4 + $0x8] sm:$0xff] (!%p423_p3)  ;;  %v596_v2 = vld [vmem:[%s3961_s4 + $0x10] sm:$0xff] (!%p423_p3)  ;;  %p521_p4 = scmp.lt.s32.totalorder (!%p423_p3), %s3011_s17, 1  ;;  %vm627_vm0 = vcmask (!%p423_p3), 523264   ;;  %vm892_vm1 = vcmask (!%p423_p3), 1043456  }
   0x7   : > { %426 = sbr.rel (%p423_p3) target bundleno = 912 (0x390), region = 52  ;;  %v3110_v3 = vpack.c.bf16 (!%p423_p3), %v595_v1, %v594_v0  ;;  %v597_v4 = vld [vmem:[%s3961_s4 + $0x18] sm:$0xff] (!%p423_p3)  ;;  %v598_v6 = vld [vmem:[%s3961_s4 + $0x20] sm:$0xff] (!%p423_p3)  ;;  %v599_v7 = vld [vmem:[%s3961_s4 + $0x28] sm:$0xff] (!%p423_p3)  ;;  %s3021_s13 = smov (!%p423_p3), 32   ;;  %vm843_vm2 = vcmask (!%p423_p3), 31744  }
   0x8   : > { %v3115_v5 = vpack.c.bf16 (!%p423_p3), %v597_v4, %v596_v2  ;;  %v3129_v8 = vpack.c.bf16 (!%p423_p3), %v599_v7, %v598_v6  ;;  %v600_v9 = vld [vmem:[%s3961_s4 + $0x30] sm:$0xff] (!%p423_p3)  ;;  %v601_v10 = vld [vmem:[%s3961_s4 + $0x38] sm:$0xff] (!%p423_p3)  ;;  %v3186_v28 = vld [vmem:[%s3963_s6] sm:$0xf] (!%p423_p3)  ;;  %vm1717_vm3 = vcmask (!%p423_p3), 261120   ;;  %vm2097_vm4 = vcmask (!%p423_p3), 523520  }
   0x9   : > { %2937 = vmatprep.subr.bf16.mxu0 (!%p423_p3), %v3110_v3  ;;  %v3148_v12 = vpack.c.bf16 (!%p423_p3), %v601_v10, %v600_v9  ;;  %2844 = vmatprep.subr.msk.mxu1 (!%p423_p3), %vm892_vm1, %v3186_v28  ;;  %v3266_v58 = vld [vmem:[%s3962_s5] ss:$0 sm:$0xff] (!%p423_p3)  ;;  %vm1987_vm5 = vcmask (!%p423_p3), 253952  }
   0xa   : > { %2939 = vmatpush3.bf16.msra.mxu0 (!%p423_p3), %v3110_v3  ;;  %2845 = vmatpush3.msk.msra.mxu1 (!%p423_p3), %vm892_vm1, %v3186_v28 }
   0xb   : > { %2941 = vmatprep.subr.bf16.mxu0 (!%p423_p3), %v3115_v5  ;;  %2953 = vmatprep.subr.bf16.mxu1 (!%p423_p3), %v3110_v3 }
   0xe   : > { %s3974_s17 = smov (!%p521_p4, %s3011_s17), 1  ;;  %2943 = vmatpush3.bf16.msra.mxu0 %v3115_v5 }
   0xf   : > { %s2716_s14 = sshll.u32 %s3974_s17, 7  ;;  %2945 = vmatprep.subr.bf16.mxu0 %v3129_v8  ;;  %s3198_s28 = sshll.u32 %s3974_s17, 8 }
  0x10   : > { %s3136_s21 = scalar_lea.vmem %s3957_s0, %s2716_s14  ;;  %s3204_s12 = scalar_lea.vmem %s3960_s3, %s3198_s28 }
  0x11   : > { %v605_v11 = vld [vmem:[%s3136_s21] sm:$0xff]  ;;  %v606_v13 = vld [vmem:[%s3136_s21 + $0x8] sm:$0xff]  ;;  %v607_v14 = vld [vmem:[%s3136_s21 + $0x10] sm:$0xff]  ;;  %s3314_s23 = scalar_lea.vmem %s3958_s1, %s2716_s14  ;;  %s3367_s25 = scalar_lea.vmem %s3959_s2, %s3198_s28 }
  0x12   : > { %2820 = vmatprep.mubr.msk.f32.mxu0 %vm627_vm0, %v605_v11  ;;  %2947 = vmatpush3.bf16.msra.mxu0 %v3129_v8  ;;  %v608_v15 = vld [vmem:[%s3136_s21 + $0x18] sm:$0xff]  ;;  %v609_v16 = vld [vmem:[%s3136_s21 + $0x20] sm:$0xff]  ;;  %v610_v17 = vld [vmem:[%s3136_s21 + $0x28] sm:$0xff] }
  0x13   : > { %2949 = vmatprep.subr.bf16.mxu0 %v3148_v12  ;;  %v611_v18 = vld [vmem:[%s3136_s21 + $0x30] sm:$0xff]  ;;  %v612_v19 = vld [vmem:[%s3136_s21 + $0x38] sm:$0xff]  ;;  %v613_v20 = vld [vmem:[%s3136_s21 + $0x40] sm:$0xff] }
  0x14   : > { %v614_v21 = vld [vmem:[%s3136_s21 + $0x48] sm:$0xff]  ;;  %v615_v22 = vld [vmem:[%s3136_s21 + $0x50] sm:$0xff]  ;;  %v616_v23 = vld [vmem:[%s3136_s21 + $0x58] sm:$0xff] }
  0x15   : > { %v617_v24 = vld [vmem:[%s3136_s21 + $0x60] sm:$0xff]  ;;  %v618_v25 = vld [vmem:[%s3136_s21 + $0x68] sm:$0xff]  ;;  %v619_v26 = vld [vmem:[%s3136_s21 + $0x70] sm:$0xff] }
  0x16   : > { %2951 = vmatpush3.bf16.msra.mxu0 %v3148_v12  ;;  %v620_v27 = vld [vmem:[%s3136_s21 + $0x78] sm:$0xff]  ;;  %v1524_v29 = vld [vmem:[%s3204_s12] sm:$0xff]  ;;  %v1525_v30 = vld [vmem:[%s3204_s12 + $0x8] sm:$0xff]  ;;  %s3663_s21 = scalar_lea.vmem %s3966_s9, %s3198_s28 }
  0x17   : > { %2910 = vmatprep.subr.msk.mxu0 %vm892_vm1, %v3186_v28  ;;  %1556 = vrot.lane.b32.xlu0 %v1524_v29, %s3021_s13  ;;  %v2666_v31 = vld [vmem:[%s3204_s12 + $0x80] sm:$0xff]  ;;  %v1526_v32 = vld [vmem:[%s3204_s12 + $0x10] sm:$0xff]  ;;  %v2667_v33 = vld [vmem:[%s3204_s12 + $0x88] sm:$0xff] }
  0x18   : > { %1653 = vrot.lane.b32.xlu1 %v2666_v31, %s3021_s13  ;;  %v1527_v34 = vld [vmem:[%s3204_s12 + $0x18] sm:$0xff]  ;;  %v2668_v35 = vld [vmem:[%s3204_s12 + $0x90] sm:$0xff]  ;;  %v1528_v36 = vld [vmem:[%s3204_s12 + $0x20] sm:$0xff] }
  0x19   : > { %2821 = vmatmul.mubr.msk.f32.vlgmr.msra.gmra.mrb[0].mxu0 %vm627_vm0, %v606_v13  ;;  %v2669_v37 = vld [vmem:[%s3204_s12 + $0x98] sm:$0xff]  ;;  %v1529_v38 = vld [vmem:[%s3204_s12 + $0x28] sm:$0xff]  ;;  %v2670_v39 = vld [vmem:[%s3204_s12 + $0xa0] sm:$0xff] }
  0x1a   : > { %2823 = vmatprep.mubr.msk.f32.mxu0 %vm627_vm0, %v607_v14  ;;  %2911 = vmatpush3.msk.msra.mxu0 %vm892_vm1, %v3186_v28  ;;  %v1530_v40 = vld [vmem:[%s3204_s12 + $0x30] sm:$0xff]  ;;  %v2671_v41 = vld [vmem:[%s3204_s12 + $0xa8] sm:$0xff]  ;;  %v1531_v42 = vld [vmem:[%s3204_s12 + $0x38] sm:$0xff] }
  0x1b   : > { %1558 = vrot.lane.b32.xlu0 %v1525_v30, %s3021_s13  ;;  %v2672_v43 = vld [vmem:[%s3204_s12 + $0xb0] sm:$0xff]  ;;  %v1532_v44 = vld [vmem:[%s3204_s12 + $0x40] sm:$0xff]  ;;  %v2673_v45 = vld [vmem:[%s3204_s12 + $0xb8] sm:$0xff] }
  0x1c   : > { %1655 = vrot.lane.b32.xlu1 %v2667_v33, %s3021_s13  ;;  %v1533_v46 = vld [vmem:[%s3204_s12 + $0x48] sm:$0xff]  ;;  %v2674_v47 = vld [vmem:[%s3204_s12 + $0xc0] sm:$0xff]  ;;  %v1534_v48 = vld [vmem:[%s3204_s12 + $0x50] sm:$0xff] }
  0x1d   : > { %2824 = vmatmul.mubr.msk.f32.gmra.mrb[2].mxu0 %vm627_vm0, %v608_v15  ;;  %v2675_v49 = vld [vmem:[%s3204_s12 + $0xc8] sm:$0xff]  ;;  %v1535_v50 = vld [vmem:[%s3204_s12 + $0x58] sm:$0xff]  ;;  %v2676_v51 = vld [vmem:[%s3204_s12 + $0xd0] sm:$0xff] }
  0x1e   : > { %2826 = vmatprep.mubr.msk.f32.mxu0 %vm627_vm0, %v609_v16  ;;  %v1536_v52 = vld [vmem:[%s3204_s12 + $0x60] sm:$0xff]  ;;  %v2677_v53 = vld [vmem:[%s3204_s12 + $0xd8] sm:$0xff]  ;;  %v1537_v54 = vld [vmem:[%s3204_s12 + $0x68] sm:$0xff] }
  0x1f   : > { %1560 = vrot.lane.b32.xlu0 %v1526_v32, %s3021_s13  ;;  %v2678_v55 = vld [vmem:[%s3204_s12 + $0xe0] sm:$0xff]  ;;  %v1538_v56 = vld [vmem:[%s3204_s12 + $0x70] sm:$0xff]  ;;  %v2679_v57 = vld [vmem:[%s3204_s12 + $0xe8] sm:$0xff] }
  0x20   : > { %1657 = vrot.lane.b32.xlu1 %v2668_v35, %s3021_s13  ;;  %v1539_v59 = vld [vmem:[%s3204_s12 + $0x78] sm:$0xff]  ;;  %v2680_v60 = vld [vmem:[%s3204_s12 + $0xf0] sm:$0xff] }
  0x21   : > { %2827 = vmatmul.mubr.msk.f32.gmra.mrb[4].mxu0 %vm627_vm0, %v610_v17 }
  0x22   : > { %2829 = vmatprep.mubr.msk.f32.mxu0 %vm627_vm0, %v611_v18 }
  0x23   : > { %1562 = vrot.lane.b32.xlu0 %v1527_v34, %s3021_s13 }
  0x24   : > { %1659 = vrot.lane.b32.xlu1 %v2669_v37, %s3021_s13 }
  0x25   : > { %2830 = vmatmul.mubr.msk.f32.gmra.mrb[6].mxu0 %vm627_vm0, %v612_v19 }
  0x26   : > { %2832 = vmatprep.mubr.msk.f32.mxu0 %vm627_vm0, %v613_v20 }
  0x27   : > { %1564 = vrot.lane.b32.xlu0 %v1528_v36, %s3021_s13 }
  0x28   : > { %1661 = vrot.lane.b32.xlu1 %v2670_v39, %s3021_s13 }
  0x29   : > { %2833 = vmatmul.mubr.msk.f32.gmra.mrb[8].mxu0 %vm627_vm0, %v614_v21 }
  0x2a   : > { %2835 = vmatprep.mubr.msk.f32.mxu0 %vm627_vm0, %v615_v22 }
  0x2b   : > { %1566 = vrot.lane.b32.xlu0 %v1529_v38, %s3021_s13 }
  0x2c   : > { %1663 = vrot.lane.b32.xlu1 %v2671_v41, %s3021_s13 }
  0x2d   : > { %2836 = vmatmul.mubr.msk.f32.gmra.mrb[10].mxu0 %vm627_vm0, %v616_v23 }
  0x2e   : > { %2838 = vmatprep.mubr.msk.f32.mxu0 %vm627_vm0, %v617_v24 }
  0x2f   : > { %1568 = vrot.lane.b32.xlu0 %v1530_v40, %s3021_s13 }
  0x30   : > { %1665 = vrot.lane.b32.xlu1 %v2672_v43, %s3021_s13 }
  0x31   : > { %2839 = vmatmul.mubr.msk.f32.gmra.mrb[12].mxu0 %vm627_vm0, %v618_v25 }
  0x32   : > { %2841 = vmatprep.mubr.msk.f32.mxu0 %vm627_vm0, %v619_v26 }
  0x33   : > { %1570 = vrot.lane.b32.xlu0 %v1531_v42, %s3021_s13 }
  0x34   : > { %1667 = vrot.lane.b32.xlu1 %v2673_v45, %s3021_s13 }
  0x35   : > { %2842 = vmatmul.mubr.msk.f32.gmra.mrb[14].mxu0 %vm627_vm0, %v620_v27 }
  0x37   : > { %1572 = vrot.lane.b32.xlu0 %v1532_v44, %s3021_s13 }
  0x38   : > { %1669 = vrot.lane.b32.xlu1 %v2674_v47, %s3021_s13  ;;  %v1042_v47 = vld [vmem:[%s3314_s23 + $0x8] sm:$0xff] }
  0x3b   : > { %1574 = vrot.lane.b32.xlu0 %v1533_v46, %s3021_s13  ;;  %v1041_v46 = vld [vmem:[%s3314_s23] sm:$0xff] }
  0x3c   : > { %1671 = vrot.lane.b32.xlu1 %v2675_v49, %s3021_s13  ;;  %v1044_v49 = vld [vmem:[%s3314_s23 + $0x18] sm:$0xff] }
  0x3f   : > { %1576 = vrot.lane.b32.xlu0 %v1534_v48, %s3021_s13  ;;  %v1043_v48 = vld [vmem:[%s3314_s23 + $0x10] sm:$0xff] }
  0x40   : > { %1673 = vrot.lane.b32.xlu1 %v2676_v51, %s3021_s13  ;;  %v1046_v51 = vld [vmem:[%s3314_s23 + $0x28] sm:$0xff] }
  0x43   : > { %1578 = vrot.lane.b32.xlu0 %v1535_v50, %s3021_s13  ;;  %v1045_v50 = vld [vmem:[%s3314_s23 + $0x20] sm:$0xff] }
  0x44   : > { %1675 = vrot.lane.b32.xlu1 %v2677_v53, %s3021_s13  ;;  %v1048_v53 = vld [vmem:[%s3314_s23 + $0x38] sm:$0xff] }
  0x47   : > { %1580 = vrot.lane.b32.xlu0 %v1536_v52, %s3021_s13  ;;  %v1047_v52 = vld [vmem:[%s3314_s23 + $0x30] sm:$0xff] }
  0x48   : > { %1677 = vrot.lane.b32.xlu1 %v2678_v55, %s3021_s13  ;;  %v1051_v55 = vld [vmem:[%s3314_s23 + $0x50] sm:$0xff] }
  0x4b   : > { %1582 = vrot.lane.b32.xlu0 %v1537_v54, %s3021_s13  ;;  %v1049_v54 = vld [vmem:[%s3314_s23 + $0x40] sm:$0xff] }
  0x4c   : > { %1679 = vrot.lane.b32.xlu1 %v2679_v57, %s3021_s13  ;;  %v1053_v57 = vld [vmem:[%s3314_s23 + $0x60] sm:$0xff] }
  0x4f   : > { %1584 = vrot.lane.b32.xlu0 %v1538_v56, %s3021_s13  ;;  %v1052_v56 = vld [vmem:[%s3314_s23 + $0x58] sm:$0xff] }
  0x50   : > { %1681 = vrot.lane.b32.xlu1 %v2680_v60, %s3021_s13  ;;  %v1055_v60 = vld [vmem:[%s3314_s23 + $0x70] sm:$0xff] }
  0x53   : > { %1586 = vrot.lane.b32.xlu0 %v1539_v59, %s3021_s13  ;;  %v1054_v59 = vld [vmem:[%s3314_s23 + $0x68] sm:$0xff] }
  0xec   : > { %v2822_v61 = vpop.f32.mrb[0].mxu0 }
  0xed   : > { %v748_v62 = vadd.f32 %v2822_v61, %v3266_v58  ;;  %v742_v63 = vpop.f32.mrb[1].mxu0  ;;  %v1056_v61 = vld [vmem:[%s3314_s23 + $0x78] sm:$0xff] }
  0xee   : > { %v743_v0 = vadd.f32 %v3266_v58, %v742_v63  ;;  %v1557_v63 = vpop.permute.xlu0 %1556 }
  0xef   : > { %v822_v4 = vmax.f32 %v748_v62, 0.0  ;;  %v2681_v62 = vld [vmem:[%s3204_s12 + $0xf8] sm:$0xff]  ;;  %s3381_s12 = scalar_lea.vmem %s3965_s8, %s3198_s28 }
  0xf0   : > { %v821_v1 = vmax.f32 %v743_v0, 0.0  ;;  %v2825_v2 = vpop.f32.mrb[2].mxu0  ;;  %1683 = vrot.lane.b32.xlu1 %v2681_v62, %s3021_s13  ;;  %s3022_s13 = smov 96  }
  0xf1   : > { %v758_v6 = vadd.f32 %v2825_v2, %v3266_v58  ;;  %v752_v7 = vpop.f32.mrb[3].mxu0 }
  0xf2   : > { %v753_v9 = vadd.f32 %v3266_v58, %v752_v7  ;;  %2846 = vmatprep.mubr.msk.f32.mxu1 %vm843_vm2, %v821_v1  ;;  %v1559_v0 = vpop.permute.xlu0 %1558 }
  0xf3   : > { %2847 = vmatmul.mubr.msk.f32.vlgmr.msra.gmra.mrb[0].mxu1 %vm843_vm2, %v822_v4  ;;  %v824_v13 = vmax.f32 %v758_v6, 0.0 }
  0xf4   : > { %v823_v10 = vmax.f32 %v753_v9, 0.0  ;;  %2955 = vmatpush3.bf16.msra.mxu1 %v3110_v3  ;;  %v2828_v11 = vpop.f32.mrb[4].mxu0 }
  0xf5   : > { %v768_v14 = vadd.f32 %v2828_v11, %v3266_v58  ;;  %v762_v15 = vpop.f32.mrb[5].mxu0  ;;  %2957 = vmatprep.subr.bf16.mxu1 %v3115_v5 }
  0xf6   : > { %v763_v16 = vadd.f32 %v3266_v58, %v762_v15  ;;  %2849 = vmatprep.mubr.msk.f32.mxu1 %vm843_vm2, %v823_v10  ;;  %v1561_v1 = vpop.permute.xlu0 %1560  ;;  %v3372_v10 = vld [vmem:[%s3964_s7] ss:$0 sm:$0xff] }
  0xf7   : > { %2850 = vmatmul.mubr.msk.f32.gmra.mrb[2].mxu1 %vm843_vm2, %v824_v13  ;;  %v826_v19 = vmax.f32 %v768_v14, 0.0  ;;  %v1460_v13 = vld [vmem:[%s3367_s25 + $0x8] sm:$0xff] }
  0xf8   : > { %v825_v17 = vmax.f32 %v763_v16, 0.0  ;;  %v2831_v18 = vpop.f32.mrb[6].mxu0  ;;  %2959 = vmatpush3.bf16.msra.mxu1 %v3115_v5  ;;  %v1459_v16 = vld [vmem:[%s3367_s25] sm:$0xff] }
  0xf9   : > { %v778_v3 = vadd.f32 %v2831_v18, %v3266_v58  ;;  %v772_v20 = vpop.f32.mrb[7].mxu0  ;;  %2961 = vmatprep.subr.bf16.mxu1 %v3129_v8 }
  0xfa   : > { %v773_v21 = vadd.f32 %v3266_v58, %v772_v20  ;;  %2852 = vmatprep.mubr.msk.f32.mxu1 %vm843_vm2, %v825_v17  ;;  %v1563_v2 = vpop.permute.xlu0 %1562 }
  0xfb   : > { %2853 = vmatmul.mubr.msk.f32.gmra.mrb[4].mxu1 %vm843_vm2, %v826_v19  ;;  %v828_v24 = vmax.f32 %v778_v3, 0.0 }
  0xfc   : > { %v827_v22 = vmax.f32 %v773_v21, 0.0  ;;  %v2834_v23 = vpop.f32.mrb[8].mxu0  ;;  %2963 = vmatpush3.bf16.msra.mxu1 %v3129_v8 }
  0xfd   : > { %v788_v25 = vadd.f32 %v2834_v23, %v3266_v58  ;;  %v782_v5 = vpop.f32.mrb[9].mxu0  ;;  %2965 = vmatprep.subr.bf16.mxu1 %v3148_v12 }
  0xfe   : > { %v783_v26 = vadd.f32 %v3266_v58, %v782_v5  ;;  %2855 = vmatprep.mubr.msk.f32.mxu1 %vm843_vm2, %v827_v22  ;;  %v3357_v4 = vpop.permute.xlu0 %1564 }
  0xff   : > { %2856 = vmatmul.mubr.msk.f32.gmra.mrb[6].mxu1 %vm843_vm2, %v828_v24  ;;  %v830_v30 = vmax.f32 %v788_v25, 0.0 }
 0x100   : > { %v829_v27 = vmax.f32 %v783_v26, 0.0  ;;  %v2837_v29 = vpop.f32.mrb[10].mxu0  ;;  %2967 = vmatpush3.bf16.msra.mxu1 %v3148_v12 }
 0x101   : > { %v798_v31 = vadd.f32 %v2837_v29, %v3266_v58  ;;  %v792_v8 = vpop.f32.mrb[11].mxu0  ;;  %2968 = vmatprep.subr.msk.mxu1 %vm892_vm1, %v3186_v28 }
 0x102   : > { %v793_v32 = vadd.f32 %v3266_v58, %v792_v8  ;;  %2858 = vmatprep.mubr.msk.f32.mxu1 %vm843_vm2, %v829_v27  ;;  %v1567_v6 = vpop.permute.xlu0 %1566 }
 0x103   : > { %2859 = vmatmul.mubr.msk.f32.gmra.mrb[8].mxu1 %vm843_vm2, %v830_v30  ;;  %v832_v35 = vmax.f32 %v798_v31, 0.0 }
 0x104   : > { %v831_v33 = vmax.f32 %v793_v32, 0.0  ;;  %v2840_v34 = vpop.f32.mrb[12].mxu0 }
 0x105   : > { %v808_v36 = vadd.f32 %v2840_v34, %v3266_v58  ;;  %v802_v12 = vpop.f32.mrb[13].mxu0 }
 0x106   : > { %v803_v37 = vadd.f32 %v3266_v58, %v802_v12  ;;  %2861 = vmatprep.mubr.msk.f32.mxu1 %vm843_vm2, %v831_v33  ;;  %v3359_v7 = vpop.permute.xlu0 %1568 }
 0x107   : > { %2862 = vmatmul.mubr.msk.f32.gmra.mrb[10].mxu1 %vm843_vm2, %v832_v35  ;;  %v834_v40 = vmax.f32 %v808_v36, 0.0  ;;  %v1462_v35 = vld [vmem:[%s3367_s25 + $0x18] sm:$0xff]  ;;  %v1461_v36 = vld [vmem:[%s3367_s25 + $0x10] sm:$0xff] }
 0x108   : > { %v833_v38 = vmax.f32 %v803_v37, 0.0  ;;  %v2843_v39 = vpop.f32.mrb[14].mxu0 }
 0x109   : > { %v818_v41 = vadd.f32 %v2843_v39, %v3266_v58  ;;  %v812_v42 = vpop.f32.mrb[15].mxu0 }
 0x10a   : > { %v813_v43 = vadd.f32 %v3266_v58, %v812_v42  ;;  %2864 = vmatprep.mubr.msk.f32.mxu1 %vm843_vm2, %v833_v38  ;;  %v3361_v9 = vpop.permute.xlu0 %1570  ;;  %v1464_v42 = vld [vmem:[%s3367_s25 + $0x28] sm:$0xff] }
 0x10b   : > { %2865 = vmatmul.mubr.msk.f32.gmra.mrb[12].mxu1 %vm843_vm2, %v834_v40  ;;  %v836_v45 = vmax.f32 %v818_v41, 0.0 }
 0x10c   : > { %v835_v44 = vmax.f32 %v813_v43, 0.0 }
 0x10e   : > { %2867 = vmatprep.mubr.msk.f32.mxu1 %vm843_vm2, %v835_v44  ;;  %v3384_v18 = vpop.permute.xlu0 %1572 }
 0x10f   : > { %2868 = vmatmul.mubr.msk.f32.gmra.mrb[14].mxu1 %vm843_vm2, %v836_v45 }
 0x110   : > { %2886 = vmatprep.mubr.msk.f32.mxu1 %vm627_vm0, %v1041_v46 }
 0x112   : > { %v3404_v40 = vpop.permute.xlu0 %1574 }
 0x113   : > { %2887 = vmatmul.mubr.msk.f32.vlgmr.msra.gmra.mrb[16].mxu1 %vm627_vm0, %v1042_v47 }
 0x114   : > { %2889 = vmatprep.mubr.msk.f32.mxu1 %vm627_vm0, %v1043_v48  ;;  %2969 = vmatpush3.msk.msra.mxu1 %vm892_vm1, %v3186_v28  ;;  %v1050_v28 = vld [vmem:[%s3314_s23 + $0x48] sm:$0xff]  ;;  %s2580_s23 = sshll.u32 %s3974_s17, 1 }
 0x115   : > { %s593_s29 = scalar_lea.vmem %s3968_s11, %s2580_s23 }
 0x117   : > { %2890 = vmatmul.mubr.msk.f32.gmra.mrb[18].mxu1 %vm627_vm0, %v1044_v49 }
 0x118   : > { %2892 = vmatprep.mubr.msk.f32.mxu1 %vm627_vm0, %v1045_v50 }
 0x11b   : > { %2893 = vmatmul.mubr.msk.f32.gmra.mrb[20].mxu1 %vm627_vm0, %v1046_v51 }
 0x11c   : > { %2895 = vmatprep.mubr.msk.f32.mxu1 %vm627_vm0, %v1047_v52 }
 0x11f   : > { %2896 = vmatmul.mubr.msk.f32.gmra.mrb[22].mxu1 %vm627_vm0, %v1048_v53 }
 0x120   : > { %2898 = vmatprep.mubr.msk.f32.mxu1 %vm627_vm0, %v1049_v54 }
 0x123   : > { %2899 = vmatmul.mubr.msk.f32.gmra.mrb[24].mxu1 %vm627_vm0, %v1050_v28 }
 0x124   : > { %2901 = vmatprep.mubr.msk.f32.mxu1 %vm627_vm0, %v1051_v55 }
 0x127   : > { %2902 = vmatmul.mubr.msk.f32.gmra.mrb[26].mxu1 %vm627_vm0, %v1052_v56 }
 0x128   : > { %2904 = vmatprep.mubr.msk.f32.mxu1 %vm627_vm0, %v1053_v57 }
 0x12b   : > { %2905 = vmatmul.mubr.msk.f32.gmra.mrb[28].mxu1 %vm627_vm0, %v1054_v59 }
 0x12c   : > { %2907 = vmatprep.mubr.msk.f32.mxu1 %vm627_vm0, %v1055_v60 }
 0x12f   : > { %2908 = vmatmul.mubr.msk.f32.gmra.mrb[30].mxu1 %vm627_vm0, %v1056_v61 }
 0x1c6   : > { %v2848_v11 = vpop.f32.mrb[0].mxu1 }
 0x1c7   : > { %v968_v14 = vadd.f32 %v2848_v11, %v3372_v10  ;;  %v962_v15 = vpop.f32.mrb[1].mxu1  ;;  %v3423_v11 = vpop.permute.xlu0 %1576 }
 0x1c8   : > { %v963_v17 = vadd.f32 %v3372_v10, %v962_v15 }
 0x1c9   : > { %v1476_v19 = vadd.f32 %v1460_v13, %v968_v14  ;;  %v1605_v3 = vadd.f32 %v1559_v0, %v968_v14 }
 0x1ca   : > { %v1475_v20 = vadd.f32 %v1459_v16, %v963_v17  ;;  %v1604_v21 = vadd.f32 %v1557_v63, %v963_v17  ;;  %v2851_v22 = vpop.f32.mrb[2].mxu1 }
 0x1cb   : > { %1719 = vst.msk [vmem:[%s3381_s12 + $0x8] sm:$0xff] %vm1717_vm3, %v1476_v19  ;;  %v1913_v23 = vsel %vm1717_vm3, %v1476_v19, 0.0  ;;  %v1990_v24 = vmul.f32 %v1476_v19, %v1476_v19  ;;  %v2099_v25 = vsel %vm2097_vm4, %v1605_v3, 0.0  ;;  %v2179_v5 = vmul.f32 %v1605_v3, %v1605_v3  ;;  %1769 = vrot.lane.b32.xlu1 %v1605_v3, %s3022_s13  ;;  %v972_v26 = vpop.f32.mrb[3].mxu1 }
 0x1cc   : > { %1718 = vst.msk [vmem:[%s3381_s12] sm:$0xff] %vm1717_vm3, %v1475_v20  ;;  %v1912_v27 = vsel %vm1717_vm3, %v1475_v20, 0.0  ;;  %v1989_v29 = vmul.f32 %v1475_v20, %v1475_v20  ;;  %v2098_v30 = vsel %vm2097_vm4, %v1604_v21, 0.0  ;;  %v2178_v31 = vmul.f32 %v1604_v21, %v1604_v21  ;;  %1767 = vrot.lane.b32.xlu0 %v1604_v21, %s3022_s13 }
 0x1cd   : > { %v2006_v8 = vsel %vm1717_vm3, %v1990_v24, 0.0  ;;  %v2195_v32 = vsel %vm2097_vm4, %v2179_v5, 0.0  ;;  %v1914_v33 = vadd.f32 %v1913_v23, %v1912_v27  ;;  %v2100_v34 = vadd.f32 %v2099_v25, %v2098_v30 }
 0x1ce   : > { %v2005_v12 = vsel %vm1717_vm3, %v1989_v29, 0.0  ;;  %v2194_v37 = vsel %vm2097_vm4, %v2178_v31, 0.0  ;;  %v978_v38 = vadd.f32 %v2851_v22, %v3372_v10  ;;  %v973_v39 = vadd.f32 %v3372_v10, %v972_v26  ;;  %v2854_v41 = vpop.f32.mrb[4].mxu1 }
 0x1cf   : > { %v2007_v43 = vadd.f32 %v2006_v8, %v2005_v12  ;;  %v2196_v44 = vadd.f32 %v2195_v32, %v2194_v37  ;;  %v988_v45 = vadd.f32 %v2854_v41, %v3372_v10  ;;  %v982_v46 = vpop.f32.mrb[5].mxu1  ;;  %v1465_v37 = vld [vmem:[%s3367_s25 + $0x30] sm:$0xff] }
 0x1d0   : > { %v1478_v47 = vadd.f32 %v1462_v35, %v978_v38  ;;  %v1607_v48 = vadd.f32 %v1563_v2, %v978_v38  ;;  %v1477_v49 = vadd.f32 %v1461_v36, %v973_v39  ;;  %v1606_v50 = vadd.f32 %v1561_v1, %v973_v39  ;;  %v3442_v38 = vpop.permute.xlu0 %1578 }
 0x1d1   : > { %v1480_v51 = vadd.f32 %v1464_v42, %v988_v45  ;;  %v1609_v52 = vadd.f32 %v1567_v6, %v988_v45  ;;  %v983_v55 = vadd.f32 %v3372_v10, %v982_v46  ;;  %v1463_v6 = vld [vmem:[%s3367_s25 + $0x20] sm:$0xff] }
 0x1d2   : > { %1721 = vst.msk [vmem:[%s3381_s12 + $0x18] sm:$0xff] %vm1717_vm3, %v1478_v47  ;;  %v1917_v53 = vsel %vm1717_vm3, %v1478_v47, 0.0  ;;  %v1992_v54 = vmul.f32 %v1478_v47, %v1478_v47  ;;  %v2181_v28 = vmul.f32 %v1607_v48, %v1607_v48  ;;  %1720 = vst.msk [vmem:[%s3381_s12 + $0x10] sm:$0xff] %vm1717_vm3, %v1477_v49  ;;  %1773 = vrot.lane.b32.xlu1 %v1607_v48, %s3022_s13  ;;  %1771 = vrot.lane.b32.xlu0 %v1606_v50, %s3022_s13  ;;  %v2857_v56 = vpop.f32.mrb[6].mxu1 }
 0x1d3   : > { %v1915_v57 = vsel %vm1717_vm3, %v1477_v49, 0.0  ;;  %v1991_v59 = vmul.f32 %v1477_v49, %v1477_v49  ;;  %v2101_v60 = vsel %vm2097_vm4, %v1606_v50, 0.0  ;;  %v2180_v61 = vmul.f32 %v1606_v50, %v1606_v50  ;;  %1723 = vst.msk [vmem:[%s3381_s12 + $0x28] sm:$0xff] %vm1717_vm3, %v1480_v51  ;;  %v992_v62 = vpop.f32.mrb[7].mxu1 }
 0x1d4   : > { %v2010_v63 = vsel %vm1717_vm3, %v1992_v54, 0.0  ;;  %v2103_v0 = vsel %vm2097_vm4, %v1607_v48, 0.0  ;;  %v1916_v1 = vadd.f32 %v1915_v57, %v1914_v33  ;;  %v2102_v2 = vadd.f32 %v2101_v60, %v2100_v34  ;;  %v1466_v34 = vld [vmem:[%s3367_s25 + $0x38] sm:$0xff]  ;;  %v3454_v54 = vpop.permute.xlu1 %1653  ;;  %v1468_v57 = vld [vmem:[%s3367_s25 + $0x48] sm:$0xff] }
 0x1d5   : > { %v2199_v13 = vsel %vm2097_vm4, %v2181_v28, 0.0  ;;  %v2008_v14 = vsel %vm1717_vm3, %v1991_v59, 0.0  ;;  %v2197_v15 = vsel %vm2097_vm4, %v2180_v61, 0.0  ;;  %v1994_v16 = vmul.f32 %v1480_v51, %v1480_v51 }
 0x1d6   : > { %v2009_v17 = vadd.f32 %v2008_v14, %v2007_v43  ;;  %v2198_v19 = vadd.f32 %v2197_v15, %v2196_v44  ;;  %v1921_v3 = vsel %vm1717_vm3, %v1480_v51, 0.0  ;;  %v2107_v20 = vsel %vm2097_vm4, %v1609_v52, 0.0  ;;  %1777 = vrot.lane.b32.xlu1 %v1609_v52, %s3022_s13  ;;  %v2860_v21 = vpop.f32.mrb[8].mxu1  ;;  %v3474_v14 = vpop.permute.xlu0 %1580 }
 0x1d7   : > { %v2183_v22 = vmul.f32 %v1609_v52, %v1609_v52  ;;  %v1479_v23 = vadd.f32 %v1463_v6, %v983_v55  ;;  %v1608_v24 = vadd.f32 %v3357_v4, %v983_v55  ;;  %v1918_v25 = vadd.f32 %v1917_v53, %v1916_v1  ;;  %v1002_v5 = vpop.f32.mrb[9].mxu1 }
 0x1d8   : > { %v2014_v26 = vsel %vm1717_vm3, %v1994_v16, 0.0  ;;  %v2011_v27 = vadd.f32 %v2010_v63, %v2009_v17  ;;  %v2104_v29 = vadd.f32 %v2103_v0, %v2102_v2  ;;  %v2200_v30 = vadd.f32 %v2199_v13, %v2198_v19  ;;  %v1467_v63 = vld [vmem:[%s3367_s25 + $0x40] sm:$0xff] }
 0x1d9   : > { %1722 = vst.msk [vmem:[%s3381_s12 + $0x20] sm:$0xff] %vm1717_vm3, %v1479_v23  ;;  %v1919_v31 = vsel %vm1717_vm3, %v1479_v23, 0.0  ;;  %v1993_v8 = vmul.f32 %v1479_v23, %v1479_v23  ;;  %v2105_v32 = vsel %vm2097_vm4, %v1608_v24, 0.0  ;;  %v2182_v33 = vmul.f32 %v1608_v24, %v1608_v24  ;;  %1775 = vrot.lane.b32.xlu0 %v1608_v24, %s3022_s13 }
 0x1da   : > { %v1920_v4 = vadd.f32 %v1919_v31, %v1918_v25  ;;  %v2106_v35 = vadd.f32 %v2105_v32, %v2104_v29  ;;  %v998_v36 = vadd.f32 %v2857_v56, %v3372_v10  ;;  %v993_v12 = vadd.f32 %v3372_v10, %v992_v62  ;;  %v3444_v39 = vpop.f32.mrb[10].mxu1  ;;  %v3487_v29 = vpop.permute.xlu1 %1655 }
 0x1db   : > { %v2203_v41 = vsel %vm2097_vm4, %v2183_v22, 0.0  ;;  %v2012_v42 = vsel %vm1717_vm3, %v1993_v8, 0.0  ;;  %v2201_v43 = vsel %vm2097_vm4, %v2182_v33, 0.0  ;;  %v1008_v44 = vadd.f32 %v2860_v21, %v3372_v10  ;;  %v3450_v45 = vpop.f32.mrb[11].mxu1 }
 0x1dc   : > { %v2013_v46 = vadd.f32 %v2012_v42, %v2011_v27  ;;  %v2202_v47 = vadd.f32 %v2201_v43, %v2200_v30  ;;  %v1482_v48 = vadd.f32 %v1466_v34, %v998_v36  ;;  %v1611_v49 = vadd.f32 %v3361_v9, %v998_v36  ;;  %v1583_v42 = vpop.permute.xlu0 %1582 }
 0x1dd   : > { %v1481_v50 = vadd.f32 %v1465_v37, %v993_v12  ;;  %v1610_v51 = vadd.f32 %v3359_v7, %v993_v12  ;;  %v1922_v52 = vadd.f32 %v1921_v3, %v1920_v4  ;;  %v2108_v53 = vadd.f32 %v2107_v20, %v2106_v35  ;;  %v1470_v37 = vld [vmem:[%s3367_s25 + $0x58] sm:$0xff] }
 0x1de   : > { %1725 = vst.msk [vmem:[%s3381_s12 + $0x38] sm:$0xff] %vm1717_vm3, %v1482_v48  ;;  %v1925_v28 = vsel %vm1717_vm3, %v1482_v48, 0.0  ;;  %v1996_v55 = vmul.f32 %v1482_v48, %v1482_v48  ;;  %v2185_v56 = vmul.f32 %v1611_v49, %v1611_v49  ;;  %1781 = vrot.lane.b32.xlu1 %v1611_v49, %s3022_s13  ;;  %v1003_v59 = vadd.f32 %v3372_v10, %v1002_v5  ;;  %v3462_v9 = vpop.f32.mrb[12].mxu1 }
 0x1df   : > { %1724 = vst.msk [vmem:[%s3381_s12 + $0x30] sm:$0xff] %vm1717_vm3, %v1481_v50  ;;  %v1923_v7 = vsel %vm1717_vm3, %v1481_v50, 0.0  ;;  %v1995_v60 = vmul.f32 %v1481_v50, %v1481_v50  ;;  %v2015_v61 = vadd.f32 %v2014_v26, %v2013_v46  ;;  %v2109_v62 = vsel %vm2097_vm4, %v1610_v51, 0.0  ;;  %1779 = vrot.lane.b32.xlu0 %v1610_v51, %s3022_s13  ;;  %v3470_v0 = vpop.f32.mrb[13].mxu1 }
 0x1e0   : > { %v2018_v1 = vsel %vm1717_vm3, %v1996_v55, 0.0  ;;  %v2111_v2 = vsel %vm2097_vm4, %v1611_v49, 0.0  ;;  %v1924_v6 = vadd.f32 %v1923_v7, %v1922_v52  ;;  %v2110_v13 = vadd.f32 %v2109_v62, %v2108_v53 }
 0x1e1   : > { %v2016_v15 = vsel %vm1717_vm3, %v1995_v60, 0.0  ;;  %v2184_v16 = vmul.f32 %v1610_v51, %v1610_v51  ;;  %v2204_v17 = vadd.f32 %v2203_v41, %v2202_v47  ;;  %v1484_v19 = vadd.f32 %v1468_v57, %v1008_v44  ;;  %v1469_v41 = vld [vmem:[%s3367_s25 + $0x50] sm:$0xff] }
 0x1e2   : > { %v2017_v3 = vadd.f32 %v2016_v15, %v2015_v61  ;;  %v1613_v20 = vadd.f32 %v3404_v40, %v1008_v44  ;;  %v1483_v21 = vadd.f32 %v1467_v63, %v1003_v59  ;;  %v1612_v22 = vadd.f32 %v3384_v18, %v1003_v59  ;;  %v3479_v23 = vpop.f32.mrb[14].mxu1  ;;  %v3511_v59 = vpop.permute.xlu1 %1657 }
 0x1e3   : > { %v2207_v24 = vsel %vm2097_vm4, %v2185_v56, 0.0  ;;  %v2205_v25 = vsel %vm2097_vm4, %v2184_v16, 0.0  ;;  %1727 = vst.msk [vmem:[%s3381_s12 + $0x48] sm:$0xff] %vm1717_vm3, %v1484_v19  ;;  %v1998_v5 = vmul.f32 %v1484_v19, %v1484_v19  ;;  %v1926_v26 = vadd.f32 %v1925_v28, %v1924_v6  ;;  %v3485_v27 = vpop.f32.mrb[15].mxu1  ;;  %v1585_v15 = vpop.permute.xlu0 %1584 }
 0x1e4   : > { %v2206_v30 = vadd.f32 %v2205_v25, %v2204_v17  ;;  %v1929_v40 = vsel %vm1717_vm3, %v1484_v19, 0.0  ;;  %v2115_v18 = vsel %vm2097_vm4, %v1613_v20, 0.0  ;;  %1726 = vst.msk [vmem:[%s3381_s12 + $0x40] sm:$0xff] %vm1717_vm3, %v1483_v21  ;;  %v1927_v31 = vsel %vm1717_vm3, %v1483_v21, 0.0  ;;  %1785 = vrot.lane.b32.xlu1 %v1613_v20, %s3022_s13  ;;  %1783 = vrot.lane.b32.xlu0 %v1612_v22, %s3022_s13  ;;  %v1471_v25 = vld [vmem:[%s3367_s25 + $0x60] sm:$0xff] }
 0x1e5   : > { %v2187_v8 = vmul.f32 %v1613_v20, %v1613_v20  ;;  %v1928_v32 = vadd.f32 %v1927_v31, %v1926_v26  ;;  %v1997_v33 = vmul.f32 %v1483_v21, %v1483_v21  ;;  %v2019_v34 = vadd.f32 %v2018_v1, %v2017_v3 }
 0x1e6   : > { %v2022_v4 = vsel %vm1717_vm3, %v1998_v5, 0.0  ;;  %v2112_v35 = vadd.f32 %v2111_v2, %v2110_v13  ;;  %v2113_v36 = vsel %vm2097_vm4, %v1612_v22, 0.0  ;;  %v2186_v12 = vmul.f32 %v1612_v22, %v1612_v22  ;;  %v3500_v43 = vpop.f32.mrb[16].mxu1 }
 0x1e7   : > { %v2020_v44 = vsel %vm1717_vm3, %v1997_v33, 0.0  ;;  %v2208_v46 = vadd.f32 %v2207_v24, %v2206_v30  ;;  %v1018_v47 = vadd.f32 %v3444_v39, %v3372_v10  ;;  %v1013_v48 = vadd.f32 %v3372_v10, %v3450_v45  ;;  %v3507_v49 = vpop.f32.mrb[17].mxu1 }
 0x1e8   : > { %v2021_v50 = vadd.f32 %v2020_v44, %v2019_v34  ;;  %v2114_v51 = vadd.f32 %v2113_v36, %v2112_v35  ;;  %v2209_v52 = vsel %vm2097_vm4, %v2186_v12, 0.0  ;;  %v1930_v53 = vadd.f32 %v1929_v40, %v1928_v32 }
 0x1e9   : > { %v2210_v28 = vadd.f32 %v2209_v52, %v2208_v46  ;;  %v1486_v55 = vadd.f32 %v1470_v37, %v1018_v47  ;;  %v1615_v56 = vadd.f32 %v3442_v38, %v1018_v47  ;;  %v1485_v57 = vadd.f32 %v1469_v41, %v1013_v48  ;;  %v1472_v38 = vld [vmem:[%s3367_s25 + $0x68] sm:$0xff]  ;;  %v1474_v37 = vld [vmem:[%s3367_s25 + $0x78] sm:$0xff]  ;;  %v1587_v47 = vpop.permute.xlu0 %1586 }
 0x1ea   : > { %v1614_v39 = vadd.f32 %v3423_v11, %v1013_v48  ;;  %v2023_v45 = vadd.f32 %v2022_v4, %v2021_v50  ;;  %v2116_v7 = vadd.f32 %v2115_v18, %v2114_v51  ;;  %v1028_v60 = vadd.f32 %v3462_v9, %v3372_v10  ;;  %v3516_v61 = vpop.f32.mrb[18].mxu1 }
 0x1eb   : > { %v2211_v62 = vsel %vm2097_vm4, %v2187_v8, 0.0  ;;  %1729 = vst.msk [vmem:[%s3381_s12 + $0x58] sm:$0xff] %vm1717_vm3, %v1486_v55  ;;  %v2000_v63 = vmul.f32 %v1486_v55, %v1486_v55  ;;  %v2189_v1 = vmul.f32 %v1615_v56, %v1615_v56  ;;  %1728 = vst.msk [vmem:[%s3381_s12 + $0x50] sm:$0xff] %vm1717_vm3, %v1485_v57  ;;  %1789 = vrot.lane.b32.xlu1 %v1615_v56, %s3022_s13  ;;  %v3525_v11 = vpop.f32.mrb[19].mxu1  ;;  %v1931_v2 = vsel %vm1717_vm3, %v1485_v57, 0.0  ;;  %v3541_v8 = vpop.permute.xlu1 %1659 }
 0x1ec   : > { %v1999_v6 = vmul.f32 %v1485_v57, %v1485_v57  ;;  %v2117_v9 = vsel %vm2097_vm4, %v1614_v39, 0.0  ;;  %v2188_v13 = vmul.f32 %v1614_v39, %v1614_v39  ;;  %1787 = vrot.lane.b32.xlu0 %v1614_v39, %s3022_s13  ;;  %v1933_v16 = vsel %vm1717_vm3, %v1486_v55, 0.0  ;;  %v1473_v57 = vld [vmem:[%s3367_s25 + $0x70] sm:$0xff] }
 0x1ed   : > { %v2119_v17 = vsel %vm2097_vm4, %v1615_v56, 0.0  ;;  %v1932_v19 = vadd.f32 %v1931_v2, %v1930_v53  ;;  %v2118_v3 = vadd.f32 %v2117_v9, %v2116_v7  ;;  %v2212_v21 = vadd.f32 %v2211_v62, %v2210_v28 }
 0x1ee   : > { %v2024_v20 = vsel %vm1717_vm3, %v1999_v6, 0.0  ;;  %v2213_v22 = vsel %vm2097_vm4, %v2188_v13, 0.0  ;;  %v1488_v24 = vadd.f32 %v1472_v38, %v1028_v60  ;;  %v3535_v5 = vpop.f32.mrb[20].mxu1  ;;  %v1617_v30 = vadd.f32 %v1583_v42, %v1028_v60 }
 0x1ef   : > { %v2025_v26 = vadd.f32 %v2024_v20, %v2023_v45  ;;  %v1023_v40 = vadd.f32 %v3372_v10, %v3470_v0  ;;  %v1934_v18 = vadd.f32 %v1933_v16, %v1932_v19  ;;  %v3539_v31 = vpop.f32.mrb[21].mxu1  ;;  %v2026_v32 = vsel %vm1717_vm3, %v2000_v63, 0.0  ;;  %v3568_v62 = vpop.permute.xlu1 %1661 }
 0x1f0   : > { %v2215_v33 = vsel %vm2097_vm4, %v2189_v1, 0.0  ;;  %v2214_v34 = vadd.f32 %v2213_v22, %v2212_v21  ;;  %1731 = vst.msk [vmem:[%s3381_s12 + $0x68] sm:$0xff] %vm1717_vm3, %v1488_v24  ;;  %v2120_v4 = vadd.f32 %v2119_v17, %v2118_v3  ;;  %v1937_v35 = vsel %vm1717_vm3, %v1488_v24, 0.0  ;;  %1793 = vrot.lane.b32.xlu1 %v1617_v30, %s3022_s13 }
 0x1f1   : > { %v2002_v36 = vmul.f32 %v1488_v24, %v1488_v24  ;;  %v1487_v12 = vadd.f32 %v1471_v25, %v1023_v40  ;;  %v1616_v0 = vadd.f32 %v3474_v14, %v1023_v40  ;;  %v2191_v41 = vmul.f32 %v1617_v30, %v1617_v30 }
 0x1f2   : > { %v2027_v42 = vadd.f32 %v2026_v32, %v2025_v26  ;;  %v2216_v44 = vadd.f32 %v2215_v33, %v2214_v34  ;;  %v1038_v46 = vadd.f32 %v3479_v23, %v3372_v10  ;;  %v3553_v48 = vpop.f32.mrb[22].mxu1  ;;  %v2123_v50 = vsel %vm2097_vm4, %v1617_v30, 0.0 }
 0x1f3   : > { %1730 = vst.msk [vmem:[%s3381_s12 + $0x60] sm:$0xff] %vm1717_vm3, %v1487_v12  ;;  %v1935_v51 = vsel %vm1717_vm3, %v1487_v12, 0.0  ;;  %v2001_v14 = vmul.f32 %v1487_v12, %v1487_v12  ;;  %v2121_v52 = vsel %vm2097_vm4, %v1616_v0, 0.0  ;;  %1791 = vrot.lane.b32.xlu0 %v1616_v0, %s3022_s13  ;;  %v3561_v53 = vpop.f32.mrb[23].mxu1  ;;  %v2190_v23 = vmul.f32 %v1616_v0, %v1616_v0 }
 0x1f4   : > { %v1936_v28 = vadd.f32 %v1935_v51, %v1934_v18  ;;  %v2122_v55 = vadd.f32 %v2121_v52, %v2120_v4  ;;  %v1490_v56 = vadd.f32 %v1474_v37, %v1038_v46  ;;  %v2030_v39 = vsel %vm1717_vm3, %v2002_v36, 0.0  ;;  %v3590_v36 = vpop.permute.xlu1 %1663 }
 0x1f5   : > { %v2028_v45 = vsel %vm1717_vm3, %v2001_v14, 0.0  ;;  %v1033_v7 = vadd.f32 %v3372_v10, %v3485_v27  ;;  %v1619_v60 = vadd.f32 %v1587_v47, %v1038_v46  ;;  %v2219_v63 = vsel %vm2097_vm4, %v2191_v41, 0.0 }
 0x1f6   : > { %v2029_v1 = vadd.f32 %v2028_v45, %v2027_v42  ;;  %v2217_v38 = vsel %vm2097_vm4, %v2190_v23, 0.0  ;;  %1733 = vst.msk [vmem:[%s3381_s12 + $0x78] sm:$0xff] %vm1717_vm3, %v1490_v56  ;;  %v1177_v2 = vadd.f32 %v3500_v43, %v3266_v58  ;;  %v3576_v6 = vpop.f32.mrb[24].mxu1  ;;  %v1938_v27 = vadd.f32 %v1937_v35, %v1936_v28 }
 0x1f7   : > { %v2218_v9 = vadd.f32 %v2217_v38, %v2216_v44  ;;  %v1489_v13 = vadd.f32 %v1473_v57, %v1033_v7  ;;  %v1618_v16 = vadd.f32 %v1585_v15, %v1033_v7  ;;  %1797 = vrot.lane.b32.xlu1 %v1619_v60, %s3022_s13  ;;  %v1211_v17 = vpop.f32.mrb[25].mxu1  ;;  %v1941_v19 = vsel %vm1717_vm3, %v1490_v56, 0.0 }
 0x1f8   : > { %v2004_v3 = vmul.f32 %v1490_v56, %v1490_v56  ;;  %v2031_v20 = vadd.f32 %v2030_v39, %v2029_v1  ;;  %v2124_v21 = vadd.f32 %v2123_v50, %v2122_v55  ;;  %v2193_v30 = vmul.f32 %v1619_v60, %v1619_v60  ;;  %v3613_v57 = vpop.permute.xlu1 %1665 }
 0x1f9   : > { %1732 = vst.msk [vmem:[%s3381_s12 + $0x70] sm:$0xff] %vm1717_vm3, %v1489_v13  ;;  %v1939_v22 = vsel %vm1717_vm3, %v1489_v13, 0.0  ;;  %v2003_v24 = vmul.f32 %v1489_v13, %v1489_v13  ;;  %v2125_v43 = vsel %vm2097_vm4, %v1618_v16, 0.0  ;;  %v2192_v25 = vmul.f32 %v1618_v16, %v1618_v16  ;;  %1795 = vrot.lane.b32.xlu0 %v1618_v16, %s3022_s13 }
 0x1fa   : > { %v1940_v15 = vadd.f32 %v1939_v22, %v1938_v27  ;;  %v2126_v26 = vadd.f32 %v2125_v43, %v2124_v21  ;;  %v2220_v40 = vadd.f32 %v2219_v63, %v2218_v9  ;;  %v2903_v18 = vpop.f32.mrb[26].mxu1  ;;  %v2127_v34 = vsel %vm2097_vm4, %v1619_v60, 0.0 }
 0x1fb   : > { %v2032_v32 = vsel %vm1717_vm3, %v2003_v24, 0.0  ;;  %v2221_v33 = vsel %vm2097_vm4, %v2192_v25, 0.0  ;;  %v1172_v4 = vadd.f32 %v3266_v58, %v3507_v49  ;;  %v1221_v35 = vpop.f32.mrb[27].mxu1  ;;  %v2034_v42 = vsel %vm1717_vm3, %v2004_v3, 0.0 }
 0x1fc   : > { %v3592_v12 = vadd.f32 %v1941_v19, %v1940_v15  ;;  %v2033_v0 = vadd.f32 %v2032_v32, %v2031_v20  ;;  %v3594_v37 = vadd.f32 %v2127_v34, %v2126_v26  ;;  %v2222_v41 = vadd.f32 %v2221_v33, %v2220_v40 }
 0x1fd   : > { %v2223_v44 = vsel %vm2097_vm4, %v2193_v30, 0.0  ;;  %v1250_v46 = vmax.f32 %v1172_v4, 0.0  ;;  %v1182_v47 = vadd.f32 %v3266_v58, %v3525_v11  ;;  %v1251_v51 = vmax.f32 %v1177_v2, 0.0  ;;  %v3624_v2 = vpop.permute.xlu1 %1667 }
 0x1fe   : > { %v3600_v50 = vadd.f32 %v2034_v42, %v2033_v0  ;;  %v3602_v49 = vadd.f32 %v2223_v44, %v2222_v41  ;;  %v1187_v14 = vadd.f32 %v3516_v61, %v3266_v58  ;;  %v2906_v52 = vpop.f32.mrb[28].mxu1  ;;  %v1192_v55 = vadd.f32 %v3266_v58, %v3539_v31 }
 0x1ff   : > { %v1252_v28 = vmax.f32 %v1182_v47, 0.0  ;;  %2912 = vmatprep.mubr.msk.f32.mxu0 %vm843_vm2, %v1250_v46  ;;  %v1231_v23 = vpop.f32.mrb[29].mxu1  ;;  %v1202_v11 = vadd.f32 %v3266_v58, %v3561_v53  ;;  %v1197_v61 = vadd.f32 %v3535_v5, %v3266_v58  ;;  %v1212_v60 = vadd.f32 %v3266_v58, %v1211_v17 }
 0x200   : > { %2913 = vmatmul.mubr.msk.f32.vlgmr.msra.gmra.mrb[16].mxu0 %vm843_vm2, %v1251_v51  ;;  %v1254_v56 = vmax.f32 %v1192_v55, 0.0  ;;  %v1253_v39 = vmax.f32 %v1187_v14, 0.0  ;;  %v1207_v1 = vadd.f32 %v3553_v48, %v3266_v58  ;;  %v1222_v13 = vadd.f32 %v3266_v58, %v1221_v35 }
 0x201   : > { %2915 = vmatprep.mubr.msk.f32.mxu0 %vm843_vm2, %v1252_v28  ;;  %v1256_v31 = vmax.f32 %v1202_v11, 0.0  ;;  %v1255_v63 = vmax.f32 %v1197_v61, 0.0  ;;  %v1258_v9 = vmax.f32 %v1212_v60, 0.0  ;;  %v1217_v17 = vadd.f32 %v3576_v6, %v3266_v58  ;;  %v3636_v3 = vpop.permute.xlu1 %1669  ;;  %v2650_v61 = vld [vmem:[%s3367_s25 + $0x80] sm:$0xff] }
 0x202   : > { %v2909_v45 = vpop.f32.mrb[30].mxu1  ;;  %v1257_v27 = vmax.f32 %v1207_v1, 0.0  ;;  %v1260_v48 = vmax.f32 %v1222_v13, 0.0  ;;  %v1232_v19 = vadd.f32 %v3266_v58, %v1231_v23  ;;  %v1227_v21 = vadd.f32 %v2903_v18, %v3266_v58 }
 0x203   : > { %v1241_v7 = vpop.f32.mrb[31].mxu1  ;;  %v1247_v53 = vadd.f32 %v2909_v45, %v3266_v58  ;;  %v1259_v20 = vmax.f32 %v1217_v17, 0.0  ;;  %v1237_v24 = vadd.f32 %v2906_v52, %v3266_v58  ;;  %v1943_v60 = vrot.slane %v3592_v12, 4 }
 0x204   : > { %2916 = vmatmul.mubr.msk.f32.gmra.mrb[18].mxu0 %vm843_vm2, %v1253_v39  ;;  %v1242_v38 = vadd.f32 %v3266_v58, %v1241_v7  ;;  %v1262_v6 = vmax.f32 %v1232_v19, 0.0  ;;  %v1261_v22 = vmax.f32 %v1227_v21, 0.0 }
 0x205   : > { %2918 = vmatprep.mubr.msk.f32.mxu0 %vm843_vm2, %v1254_v56  ;;  %v1265_v16 = vmax.f32 %v1247_v53, 0.0  ;;  %v3642_v43 = vpop.permute.xlu1 %1671  ;;  %v1263_v25 = vmax.f32 %v1237_v24, 0.0  ;;  %v2651_v56 = vld [vmem:[%s3367_s25 + $0x88] sm:$0xff] }
 0x206   : > { %v1264_v5 = vmax.f32 %v1242_v38, 0.0 }
 0x208   : > { %2919 = vmatmul.mubr.msk.f32.gmra.mrb[20].mxu0 %vm843_vm2, %v1255_v63  ;;  %2933 = vmatprep.mubr.msk.f32.mxu1 %vm843_vm2, %v1264_v5 }
 0x209   : > { %2921 = vmatprep.mubr.msk.f32.mxu0 %vm843_vm2, %v1256_v31  ;;  %2934 = vmatmul.mubr.msk.f32.vlgmr.msra.gmra.mrb[32].mxu1 %vm843_vm2, %v1265_v16  ;;  %v3647_v15 = vpop.permute.xlu1 %1673 }
 0x20c   : > { %2922 = vmatmul.mubr.msk.f32.gmra.mrb[22].mxu0 %vm843_vm2, %v1257_v27 }
 0x20d   : > { %2924 = vmatprep.mubr.msk.f32.mxu0 %vm843_vm2, %v1258_v9  ;;  %v3649_v26 = vpop.permute.xlu1 %1675 }
 0x210   : > { %2925 = vmatmul.mubr.msk.f32.gmra.mrb[24].mxu0 %vm843_vm2, %v1259_v20 }
 0x211   : > { %2927 = vmatprep.mubr.msk.f32.mxu0 %vm843_vm2, %v1260_v48  ;;  %v3651_v30 = vpop.permute.xlu1 %1677 }
 0x214   : > { %2928 = vmatmul.mubr.msk.f32.gmra.mrb[26].mxu0 %vm843_vm2, %v1261_v22  ;;  %v2652_v22 = vld [vmem:[%s3367_s25 + $0x90] sm:$0xff] }
 0x215   : > { %2930 = vmatprep.mubr.msk.f32.mxu0 %vm843_vm2, %v1262_v6  ;;  %v3653_v40 = vpop.permute.xlu1 %1679  ;;  %v2653_v6 = vld [vmem:[%s3367_s25 + $0x98] sm:$0xff] }
 0x218   : > { %2931 = vmatmul.mubr.msk.f32.gmra.mrb[28].mxu0 %vm843_vm2, %v1263_v25 }
 0x219   : > { %v3655_v18 = vpop.permute.xlu1 %1681 }
 0x21d   : > { %v3657_v58 = vpop.permute.xlu1 %1683 }
 0x23d   : > { %v1770_v32 = vpop.permute.xlu1 %1769 }
 0x23e   : > { %1816 = vst.msk [vmem:[%s3663_s21 + $0x8] sm:$0xff] %vm1717_vm3, %v1770_v32  ;;  %v1768_v33 = vpop.permute.xlu0 %1767 }
 0x23f   : > { %1815 = vst.msk [vmem:[%s3663_s21] sm:$0xff] %vm1717_vm3, %v1768_v33 }
 0x244   : > { %v1774_v34 = vpop.permute.xlu1 %1773  ;;  %v1772_v4 = vpop.permute.xlu0 %1771 }
 0x245   : > { %1818 = vst.msk [vmem:[%s3663_s21 + $0x18] sm:$0xff] %vm1717_vm3, %v1774_v34  ;;  %1817 = vst.msk [vmem:[%s3663_s21 + $0x10] sm:$0xff] %vm1717_vm3, %v1772_v4  ;;  %v2655_v4 = vld [vmem:[%s3367_s25 + $0xa8] sm:$0xff] }
 0x248   : > { %v1778_v35 = vpop.permute.xlu1 %1777 }
 0x249   : > { %1820 = vst.msk [vmem:[%s3663_s21 + $0x28] sm:$0xff] %vm1717_vm3, %v1778_v35  ;;  %v2129_v35 = vrot.slane %v3594_v37, 4 }
 0x24b   : > { %v1776_v0 = vpop.permute.xlu0 %1775 }
 0x24c   : > { %1819 = vst.msk [vmem:[%s3663_s21 + $0x20] sm:$0xff] %vm1717_vm3, %v1776_v0 }
 0x250   : > { %v1782_v41 = vpop.permute.xlu1 %1781 }
 0x251   : > { %1822 = vst.msk [vmem:[%s3663_s21 + $0x38] sm:$0xff] %vm1717_vm3, %v1782_v41  ;;  %v1780_v42 = vpop.permute.xlu0 %1779 }
 0x252   : > { %1821 = vst.msk [vmem:[%s3663_s21 + $0x30] sm:$0xff] %vm1717_vm3, %v1780_v42 }
 0x256   : > { %v1786_v44 = vpop.permute.xlu1 %1785  ;;  %v1784_v46 = vpop.permute.xlu0 %1783 }
 0x257   : > { %1824 = vst.msk [vmem:[%s3663_s21 + $0x48] sm:$0xff] %vm1717_vm3, %v1786_v44  ;;  %1823 = vst.msk [vmem:[%s3663_s21 + $0x40] sm:$0xff] %vm1717_vm3, %v1784_v46 }
 0x25d   : > { %v1790_v47 = vpop.permute.xlu1 %1789 }
 0x25e   : > { %1826 = vst.msk [vmem:[%s3663_s21 + $0x58] sm:$0xff] %vm1717_vm3, %v1790_v47  ;;  %v1788_v51 = vpop.permute.xlu0 %1787 }
 0x25f   : > { %1825 = vst.msk [vmem:[%s3663_s21 + $0x50] sm:$0xff] %vm1717_vm3, %v1788_v51 }
 0x262   : > { %v1794_v14 = vpop.permute.xlu1 %1793 }
 0x263   : > { %1828 = vst.msk [vmem:[%s3663_s21 + $0x68] sm:$0xff] %vm1717_vm3, %v1794_v14 }
 0x265   : > { %v1792_v52 = vpop.permute.xlu0 %1791 }
 0x266   : > { %1827 = vst.msk [vmem:[%s3663_s21 + $0x60] sm:$0xff] %vm1717_vm3, %v1792_v52  ;;  %v3728_v52 = vadd.f32 %v1943_v60, %v3592_v12 }
 0x269   : > { %v1798_v28 = vpop.permute.xlu1 %1797 }
 0x26a   : > { %1830 = vst.msk [vmem:[%s3663_s21 + $0x78] sm:$0xff] %vm1717_vm3, %v1798_v28  ;;  %v2036_v28 = vrot.slane %v3600_v50, 4 }
 0x26b   : > { %v1796_v55 = vpop.permute.xlu0 %1795 }
 0x26c   : > { %1829 = vst.msk [vmem:[%s3663_s21 + $0x70] sm:$0xff] %vm1717_vm3, %v1796_v55 }
 0x2d3   : > { %v2914_v23 = vpop.f32.mrb[16].mxu0 }
 0x2d4   : > { %v1386_v11 = vadd.f32 %v2914_v23, %v3372_v10  ;;  %v1380_v39 = vpop.f32.mrb[17].mxu0 }
 0x2d5   : > { %v1381_v45 = vadd.f32 %v3372_v10, %v1380_v39 }
 0x2d6   : > { %v1509_v7 = vadd.f32 %v2651_v56, %v1386_v11  ;;  %v1702_v31 = vadd.f32 %v3487_v29, %v1386_v11 }
 0x2d7   : > { %v1508_v63 = vadd.f32 %v2650_v61, %v1381_v45  ;;  %v1701_v1 = vadd.f32 %v3454_v54, %v1381_v45  ;;  %v2917_v53 = vpop.f32.mrb[18].mxu0 }
 0x2d8   : > { %2683 = vst.msk [vmem:[%s3381_s12 + $0x88] sm:$0xff] %vm1717_vm3, %v1509_v7  ;;  %v1950_v38 = vsel %vm1717_vm3, %v1509_v7, 0.0  ;;  %v2043_v5 = vmul.f32 %v1509_v7, %v1509_v7  ;;  %v2136_v9 = vsel %vm2097_vm4, %v1702_v31, 0.0  ;;  %v2232_v13 = vmul.f32 %v1702_v31, %v1702_v31  ;;  %1849 = vrot.lane.b32.xlu1 %v1702_v31, %s3022_s13  ;;  %v1390_v16 = vpop.f32.mrb[19].mxu0 }
 0x2d9   : > { %2682 = vst.msk [vmem:[%s3381_s12 + $0x80] sm:$0xff] %vm1717_vm3, %v1508_v63  ;;  %v1949_v29 = vsel %vm1717_vm3, %v1508_v63, 0.0  ;;  %v2042_v54 = vmul.f32 %v1508_v63, %v1508_v63  ;;  %v2135_v27 = vsel %vm2097_vm4, %v1701_v1, 0.0  ;;  %v2231_v17 = vmul.f32 %v1701_v1, %v1701_v1  ;;  %1847 = vrot.lane.b32.xlu0 %v1701_v1, %s3022_s13 }
 0x2da   : > { %v2059_v48 = vsel %vm1717_vm3, %v2043_v5, 0.0  ;;  %v2248_v19 = vsel %vm2097_vm4, %v2232_v13, 0.0  ;;  %v1951_v20 = vadd.f32 %v1950_v38, %v1949_v29  ;;  %v2137_v21 = vadd.f32 %v2136_v9, %v2135_v27  ;;  %v2654_v5 = vld [vmem:[%s3367_s25 + $0xa0] sm:$0xff] }
 0x2db   : > { %v2058_v24 = vsel %vm1717_vm3, %v2042_v54, 0.0  ;;  %v2247_v25 = vsel %vm2097_vm4, %v2231_v17, 0.0  ;;  %v1396_v32 = vadd.f32 %v2917_v53, %v3372_v10  ;;  %v1391_v33 = vadd.f32 %v3372_v10, %v1390_v16  ;;  %v2920_v34 = vpop.f32.mrb[20].mxu0 }
 0x2dc   : > { %v2060_v0 = vadd.f32 %v2059_v48, %v2058_v24  ;;  %v2249_v41 = vadd.f32 %v2248_v19, %v2247_v25  ;;  %v1406_v42 = vadd.f32 %v2920_v34, %v3372_v10  ;;  %v1400_v44 = vpop.f32.mrb[21].mxu0  ;;  %v3732_v56 = vpop.f32.mrb[32].mxu1 }
 0x2dd   : > { %v1511_v46 = vadd.f32 %v2653_v6, %v1396_v32  ;;  %v1704_v47 = vadd.f32 %v3541_v8, %v1396_v32  ;;  %v1510_v51 = vadd.f32 %v2652_v22, %v1391_v33  ;;  %v1703_v14 = vadd.f32 %v3511_v59, %v1391_v33 }
 0x2de   : > { %v1513_v55 = vadd.f32 %v2655_v4, %v1406_v42  ;;  %v1706_v23 = vadd.f32 %v3590_v36, %v1406_v42  ;;  %v1401_v59 = vadd.f32 %v3372_v10, %v1400_v44  ;;  %v3742_v36 = vpop.f32.mrb[33].mxu1  ;;  %v2657_v44 = vld [vmem:[%s3367_s25 + $0xb8] sm:$0xff] }
 0x2df   : > { %2685 = vst.msk [vmem:[%s3381_s12 + $0x98] sm:$0xff] %vm1717_vm3, %v1511_v46  ;;  %v1954_v11 = vsel %vm1717_vm3, %v1511_v46, 0.0  ;;  %v2045_v39 = vmul.f32 %v1511_v46, %v1511_v46  ;;  %v2234_v8 = vmul.f32 %v1704_v47, %v1704_v47  ;;  %2684 = vst.msk [vmem:[%s3381_s12 + $0x90] sm:$0xff] %vm1717_vm3, %v1510_v51  ;;  %1853 = vrot.lane.b32.xlu1 %v1704_v47, %s3022_s13  ;;  %1851 = vrot.lane.b32.xlu0 %v1703_v14, %s3022_s13  ;;  %v2923_v12 = vpop.f32.mrb[22].mxu0 }
 0x2e0   : > { %v1952_v61 = vsel %vm1717_vm3, %v1510_v51, 0.0  ;;  %v2044_v45 = vmul.f32 %v1510_v51, %v1510_v51  ;;  %v2138_v7 = vsel %vm2097_vm4, %v1703_v14, 0.0  ;;  %v2233_v31 = vmul.f32 %v1703_v14, %v1703_v14  ;;  %2687 = vst.msk [vmem:[%s3381_s12 + $0xa8] sm:$0xff] %vm1717_vm3, %v1513_v55  ;;  %v1410_v60 = vpop.f32.mrb[23].mxu0  ;;  %v2656_v14 = vld [vmem:[%s3367_s25 + $0xb0] sm:$0xff] }
 0x2e1   : > { %v2063_v63 = vsel %vm1717_vm3, %v2045_v39, 0.0  ;;  %v2140_v1 = vsel %vm2097_vm4, %v1704_v47, 0.0  ;;  %v1953_v53 = vadd.f32 %v1952_v61, %v1951_v20  ;;  %v2139_v38 = vadd.f32 %v2138_v7, %v2137_v21 }
 0x2e2   : > { %v2252_v9 = vsel %vm2097_vm4, %v2234_v8, 0.0  ;;  %v2061_v13 = vsel %vm1717_vm3, %v2044_v45, 0.0  ;;  %v2250_v16 = vsel %vm2097_vm4, %v2233_v31, 0.0  ;;  %v2047_v29 = vmul.f32 %v1513_v55, %v1513_v55 }
 0x2e3   : > { %v2062_v54 = vadd.f32 %v2061_v13, %v2060_v0  ;;  %v2251_v27 = vadd.f32 %v2250_v16, %v2249_v41  ;;  %v1958_v17 = vsel %vm1717_vm3, %v1513_v55, 0.0  ;;  %v2144_v48 = vsel %vm2097_vm4, %v1706_v23, 0.0  ;;  %1857 = vrot.lane.b32.xlu1 %v1706_v23, %s3022_s13  ;;  %v2926_v19 = vpop.f32.mrb[24].mxu0 }
 0x2e4   : > { %v2236_v20 = vmul.f32 %v1706_v23, %v1706_v23  ;;  %v1512_v21 = vadd.f32 %v2654_v5, %v1401_v59  ;;  %v1705_v6 = vadd.f32 %v3568_v62, %v1401_v59  ;;  %v1955_v22 = vadd.f32 %v1954_v11, %v1953_v53  ;;  %v1420_v24 = vpop.f32.mrb[25].mxu0  ;;  %v2659_v5 = vld [vmem:[%s3367_s25 + $0xc8] sm:$0xff] }
 0x2e5   : > { %v2067_v25 = vsel %vm1717_vm3, %v2047_v29, 0.0  ;;  %v2064_v32 = vadd.f32 %v2063_v63, %v2062_v54  ;;  %v2141_v33 = vadd.f32 %v2140_v1, %v2139_v38  ;;  %v2253_v34 = vadd.f32 %v2252_v9, %v2251_v27  ;;  %v3786_v9 = vld [vmem:[%s3964_s7] ss:$0 sm:$0xff] }
 0x2e6   : > { %2686 = vst.msk [vmem:[%s3381_s12 + $0xa0] sm:$0xff] %vm1717_vm3, %v1512_v21  ;;  %v1956_v4 = vsel %vm1717_vm3, %v1512_v21, 0.0  ;;  %v2046_v0 = vmul.f32 %v1512_v21, %v1512_v21  ;;  %v2142_v41 = vsel %vm2097_vm4, %v1705_v6, 0.0  ;;  %v2235_v42 = vmul.f32 %v1705_v6, %v1705_v6  ;;  %1855 = vrot.lane.b32.xlu0 %v1705_v6, %s3022_s13  ;;  %v2658_v27 = vld [vmem:[%s3367_s25 + $0xc0] sm:$0xff] }
 0x2e7   : > { %v1957_v62 = vadd.f32 %v1956_v4, %v1955_v22  ;;  %v2143_v46 = vadd.f32 %v2142_v41, %v2141_v33  ;;  %v1416_v47 = vadd.f32 %v2923_v12, %v3372_v10  ;;  %v1411_v51 = vadd.f32 %v3372_v10, %v1410_v60  ;;  %v3768_v55 = vpop.f32.mrb[26].mxu0 }
 0x2e8   : > { %v2256_v23 = vsel %vm2097_vm4, %v2236_v20, 0.0  ;;  %v2065_v11 = vsel %vm1717_vm3, %v2046_v0, 0.0  ;;  %v2254_v39 = vsel %vm2097_vm4, %v2235_v42, 0.0  ;;  %v1426_v8 = vadd.f32 %v2926_v19, %v3372_v10  ;;  %v3774_v59 = vpop.f32.mrb[27].mxu0 }
 0x2e9   : > { %v2066_v61 = vadd.f32 %v2065_v11, %v2064_v32  ;;  %v2255_v45 = vadd.f32 %v2254_v39, %v2253_v34  ;;  %v1515_v12 = vadd.f32 %v2657_v44, %v1416_v47  ;;  %v1708_v7 = vadd.f32 %v3624_v2, %v1416_v47 }
 0x2ea   : > { %v1514_v31 = vadd.f32 %v2656_v14, %v1411_v51  ;;  %v1707_v60 = vadd.f32 %v3613_v57, %v1411_v51  ;;  %v1959_v63 = vadd.f32 %v1958_v17, %v1957_v62  ;;  %v2145_v1 = vadd.f32 %v2144_v48, %v2143_v46 }
 0x2eb   : > { %2689 = vst.msk [vmem:[%s3381_s12 + $0xb8] sm:$0xff] %vm1717_vm3, %v1515_v12  ;;  %v1962_v53 = vsel %vm1717_vm3, %v1515_v12, 0.0  ;;  %v2049_v38 = vmul.f32 %v1515_v12, %v1515_v12  ;;  %v2238_v10 = vmul.f32 %v1708_v7, %v1708_v7  ;;  %1861 = vrot.lane.b32.xlu1 %v1708_v7, %s3022_s13  ;;  %v1421_v2 = vadd.f32 %v3786_v9, %v1420_v24  ;;  %v2932_v57 = vpop.f32.mrb[28].mxu0  ;;  %v2660_v12 = vld [vmem:[%s3367_s25 + $0xd0] sm:$0xff] }
 0x2ec   : > { %2688 = vst.msk [vmem:[%s3381_s12 + $0xb0] sm:$0xff] %vm1717_vm3, %v1514_v31  ;;  %v1960_v13 = vsel %vm1717_vm3, %v1514_v31, 0.0  ;;  %v2048_v16 = vmul.f32 %v1514_v31, %v1514_v31  ;;  %v2068_v29 = vadd.f32 %v2067_v25, %v2066_v61  ;;  %v2146_v54 = vsel %vm2097_vm4, %v1707_v60, 0.0  ;;  %1859 = vrot.lane.b32.xlu0 %v1707_v60, %s3022_s13  ;;  %v3795_v17 = vpop.f32.mrb[29].mxu0 }
 0x2ed   : > { %v2071_v48 = vsel %vm1717_vm3, %v2049_v38, 0.0  ;;  %v2148_v19 = vsel %vm2097_vm4, %v1708_v7, 0.0  ;;  %v1961_v20 = vadd.f32 %v1960_v13, %v1959_v63  ;;  %v2147_v21 = vadd.f32 %v2146_v54, %v2145_v1 }
 0x2ee   : > { %v2069_v6 = vsel %vm1717_vm3, %v2048_v16, 0.0  ;;  %v2237_v22 = vmul.f32 %v1707_v60, %v1707_v60  ;;  %v2257_v24 = vadd.f32 %v2256_v23, %v2255_v45  ;;  %v1517_v25 = vadd.f32 %v2659_v5, %v1426_v8  ;;  %v2661_v45 = vld [vmem:[%s3367_s25 + $0xd8] sm:$0xff] }
 0x2ef   : > { %v2070_v32 = vadd.f32 %v2069_v6, %v2068_v29  ;;  %v1710_v33 = vadd.f32 %v3642_v43, %v1426_v8  ;;  %v1516_v34 = vadd.f32 %v2658_v27, %v1421_v2  ;;  %v1709_v4 = vadd.f32 %v3636_v3, %v1421_v2 }
 0x2f0   : > { %v2260_v0 = vsel %vm2097_vm4, %v2238_v10, 0.0  ;;  %v2258_v41 = vsel %vm2097_vm4, %v2237_v22, 0.0  ;;  %2691 = vst.msk [vmem:[%s3381_s12 + $0xc8] sm:$0xff] %vm1717_vm3, %v1517_v25  ;;  %v2051_v42 = vmul.f32 %v1517_v25, %v1517_v25  ;;  %v1963_v44 = vadd.f32 %v1962_v53, %v1961_v20 }
 0x2f1   : > { %v2259_v62 = vadd.f32 %v2258_v41, %v2257_v24  ;;  %v1966_v46 = vsel %vm1717_vm3, %v1517_v25, 0.0  ;;  %v2152_v47 = vsel %vm2097_vm4, %v1710_v33, 0.0  ;;  %2690 = vst.msk [vmem:[%s3381_s12 + $0xc0] sm:$0xff] %vm1717_vm3, %v1516_v34  ;;  %v1964_v43 = vsel %vm1717_vm3, %v1516_v34, 0.0  ;;  %1865 = vrot.lane.b32.xlu1 %v1710_v33, %s3022_s13  ;;  %1863 = vrot.lane.b32.xlu0 %v1709_v4, %s3022_s13 }
 0x2f2   : > { %v2240_v3 = vmul.f32 %v1710_v33, %v1710_v33  ;;  %v1965_v51 = vadd.f32 %v1964_v43, %v1963_v44  ;;  %v2050_v14 = vmul.f32 %v1516_v34, %v1516_v34  ;;  %v2072_v23 = vadd.f32 %v2071_v48, %v2070_v32 }
 0x2f3   : > { %v2075_v11 = vsel %vm1717_vm3, %v2051_v42, 0.0  ;;  %v2149_v39 = vadd.f32 %v2148_v19, %v2147_v21  ;;  %v2150_v8 = vsel %vm2097_vm4, %v1709_v4, 0.0  ;;  %v2239_v61 = vmul.f32 %v1709_v4, %v1709_v4  ;;  %v2662_v4 = vld [vmem:[%s3367_s25 + $0xe0] sm:$0xff] }
 0x2f4   : > { %v2073_v7 = vsel %vm1717_vm3, %v2050_v14, 0.0  ;;  %v2261_v31 = vadd.f32 %v2260_v0, %v2259_v62  ;;  %v1436_v60 = vadd.f32 %v3786_v9, %v3768_v55  ;;  %v1431_v63 = vadd.f32 %v3786_v9, %v3774_v59 }
 0x2f5   : > { %v2074_v1 = vadd.f32 %v2073_v7, %v2072_v23  ;;  %v2151_v53 = vadd.f32 %v2150_v8, %v2149_v39  ;;  %v2262_v38 = vsel %vm2097_vm4, %v2239_v61, 0.0  ;;  %v1967_v10 = vadd.f32 %v1966_v46, %v1965_v51  ;;  %v2665_v23 = vld [vmem:[%s3367_s25 + $0xf8] sm:$0xff] }
 0x2f6   : > { %v2263_v5 = vadd.f32 %v2262_v38, %v2261_v31  ;;  %v1519_v2 = vadd.f32 %v2661_v45, %v1436_v60  ;;  %v1712_v13 = vadd.f32 %v3649_v26, %v1436_v60  ;;  %v1518_v16 = vadd.f32 %v2660_v12, %v1431_v63 }
 0x2f7   : > { %v1711_v29 = vadd.f32 %v3647_v15, %v1431_v63  ;;  %v2076_v54 = vadd.f32 %v2075_v11, %v2074_v1  ;;  %v2153_v55 = vadd.f32 %v2152_v47, %v2151_v53  ;;  %v1446_v27 = vadd.f32 %v3786_v9, %v2932_v57  ;;  %v2663_v15 = vld [vmem:[%s3367_s25 + $0xe8] sm:$0xff]  ;;  %v2664_v1 = vld [vmem:[%s3367_s25 + $0xf0] sm:$0xff]  ;;  %s586_s25 = scalar_lea.vmem %s3967_s10, %s2580_s23 }
 0x2f8   : > { %v3829_v59 = vadd.f32 %v2129_v35, %v3594_v37  ;;  %v2264_v48 = vsel %vm2097_vm4, %v2240_v3, 0.0  ;;  %2693 = vst.msk [vmem:[%s3381_s12 + $0xd8] sm:$0xff] %vm1717_vm3, %v1519_v2  ;;  %v1970_v19 = vsel %vm1717_vm3, %v1519_v2, 0.0  ;;  %v2053_v20 = vmul.f32 %v1519_v2, %v1519_v2  ;;  %2692 = vst.msk [vmem:[%s3381_s12 + $0xd0] sm:$0xff] %vm1717_vm3, %v1518_v16  ;;  %1869 = vrot.lane.b32.xlu1 %v1712_v13, %s3022_s13 }
 0x2f9   : > { %v1968_v26 = vsel %vm1717_vm3, %v1518_v16, 0.0  ;;  %v2052_v57 = vmul.f32 %v1518_v16, %v1518_v16  ;;  %v2154_v21 = vsel %vm2097_vm4, %v1711_v29, 0.0  ;;  %v2241_v37 = vmul.f32 %v1711_v29, %v1711_v29  ;;  %1867 = vrot.lane.b32.xlu0 %v1711_v29, %s3022_s13 }
 0x2fa   : > { %v2156_v35 = vsel %vm2097_vm4, %v1712_v13, 0.0  ;;  %v2242_v6 = vmul.f32 %v1712_v13, %v1712_v13  ;;  %v1969_v22 = vadd.f32 %v1968_v26, %v1967_v10  ;;  %v2155_v24 = vadd.f32 %v2154_v21, %v2153_v55 }
 0x2fb   : > { %v2077_v25 = vsel %vm1717_vm3, %v2052_v57, 0.0  ;;  %v2265_v32 = vadd.f32 %v2264_v48, %v2263_v5  ;;  %v2266_v33 = vsel %vm2097_vm4, %v2241_v37, 0.0  ;;  %v1521_v34 = vadd.f32 %v2663_v15, %v1446_v27 }
 0x2fc   : > { %v2078_v0 = vadd.f32 %v2077_v25, %v2076_v54  ;;  %v1714_v41 = vadd.f32 %v3653_v40, %v1446_v27  ;;  %v1441_v42 = vadd.f32 %v3786_v9, %v3795_v17  ;;  %v1971_v44 = vadd.f32 %v1970_v19, %v1969_v22 }
 0x2fd   : > { %v1945_v62 = vrot.slane %v3728_v52, 2  ;;  %v2225_v46 = vrot.slane %v3602_v49, 4  ;;  %v2267_v47 = vadd.f32 %v2266_v33, %v2265_v32  ;;  %2695 = vst.msk [vmem:[%s3381_s12 + $0xe8] sm:$0xff] %vm1717_vm3, %v1521_v34  ;;  %v2157_v43 = vadd.f32 %v2156_v35, %v2155_v24 }
 0x2fe   : > { %v2079_v3 = vsel %vm1717_vm3, %v2053_v20, 0.0  ;;  %v2268_v51 = vsel %vm2097_vm4, %v2242_v6, 0.0  ;;  %v1520_v14 = vadd.f32 %v2662_v4, %v1441_v42  ;;  %v1713_v40 = vadd.f32 %v3651_v30, %v1441_v42  ;;  %1873 = vrot.lane.b32.xlu1 %v1714_v41, %s3022_s13 }
 0x2ff   : > { %v2055_v17 = vmul.f32 %v1521_v34, %v1521_v34  ;;  %v2080_v11 = vadd.f32 %v2079_v3, %v2078_v0  ;;  %v2269_v39 = vadd.f32 %v2268_v51, %v2267_v47  ;;  %v1456_v8 = vadd.f32 %v3786_v9, %v3732_v56 }
 0x300   : > { %v2244_v61 = vmul.f32 %v1714_v41, %v1714_v41  ;;  %2694 = vst.msk [vmem:[%s3381_s12 + $0xe0] sm:$0xff] %vm1717_vm3, %v1520_v14  ;;  %v1972_v45 = vsel %vm1717_vm3, %v1520_v14, 0.0  ;;  %v2054_v12 = vmul.f32 %v1520_v14, %v1520_v14  ;;  %v2158_v7 = vsel %vm2097_vm4, %v1713_v40, 0.0  ;;  %1871 = vrot.lane.b32.xlu0 %v1713_v40, %s3022_s13 }
 0x301   : > { %v1973_v30 = vadd.f32 %v1972_v45, %v1971_v44  ;;  %v2159_v31 = vadd.f32 %v2158_v7, %v2157_v43  ;;  %v2243_v60 = vmul.f32 %v1713_v40, %v1713_v40  ;;  %v1523_v63 = vadd.f32 %v2665_v23, %v1456_v8 }
 0x302   : > { %v2037_v56 = vadd.f32 %v2036_v28, %v3600_v50  ;;  %v2081_v53 = vsel %vm1717_vm3, %v2054_v12, 0.0  ;;  %v1716_v38 = vadd.f32 %v3657_v58, %v1456_v8  ;;  %v1451_v10 = vadd.f32 %v3786_v9, %v3742_v36 }
 0x303   : > { %v1974_v5 = vsel %vm1717_vm3, %v1521_v34, 0.0  ;;  %v2160_v2 = vsel %vm2097_vm4, %v1714_v41, 0.0  ;;  %v2082_v13 = vadd.f32 %v2081_v53, %v2080_v11  ;;  %v2270_v16 = vsel %vm2097_vm4, %v2243_v60, 0.0  ;;  %2697 = vst.msk [vmem:[%s3381_s12 + $0xf8] sm:$0xff] %vm1717_vm3, %v1523_v63 }
 0x304   : > { %v2083_v29 = vsel %vm1717_vm3, %v2055_v17, 0.0  ;;  %v2272_v50 = vsel %vm2097_vm4, %v2244_v61, 0.0  ;;  %v2271_v28 = vadd.f32 %v2270_v16, %v2269_v39  ;;  %v1522_v54 = vadd.f32 %v2664_v1, %v1451_v10  ;;  %1877 = vrot.lane.b32.xlu1 %v1716_v38, %s3022_s13 }
 0x305   : > { %v2057_v58 = vmul.f32 %v1523_v63, %v1523_v63  ;;  %v1715_v36 = vadd.f32 %v3655_v18, %v1451_v10  ;;  %v1975_v9 = vadd.f32 %v1974_v5, %v1973_v30  ;;  %v2084_v55 = vadd.f32 %v2083_v29, %v2082_v13 }
 0x306   : > { %v2246_v27 = vmul.f32 %v1716_v38, %v1716_v38  ;;  %2696 = vst.msk [vmem:[%s3381_s12 + $0xf0] sm:$0xff] %vm1717_vm3, %v1522_v54  ;;  %v1976_v48 = vsel %vm1717_vm3, %v1522_v54, 0.0  ;;  %v2056_v19 = vmul.f32 %v1522_v54, %v1522_v54  ;;  %v2161_v20 = vadd.f32 %v2160_v2, %v2159_v31 }
 0x307   : > { %v1977_v15 = vadd.f32 %v1976_v48, %v1975_v9  ;;  %v2162_v26 = vsel %vm2097_vm4, %v1715_v36, 0.0  ;;  %v2245_v57 = vmul.f32 %v1715_v36, %v1715_v36  ;;  %v2273_v21 = vadd.f32 %v2272_v50, %v2271_v28  ;;  %1875 = vrot.lane.b32.xlu0 %v1715_v36, %s3022_s13 }
 0x308   : > { %v1978_v37 = vsel %vm1717_vm3, %v1523_v63, 0.0  ;;  %v2085_v18 = vsel %vm1717_vm3, %v2056_v19, 0.0  ;;  %v2163_v35 = vadd.f32 %v2162_v26, %v2161_v20  ;;  %v2226_v6 = vadd.f32 %v2225_v46, %v3602_v49 }
 0x309   : > { %v2164_v22 = vsel %vm2097_vm4, %v1716_v38, 0.0  ;;  %v1979_v24 = vadd.f32 %v1978_v37, %v1977_v15  ;;  %v2086_v25 = vadd.f32 %v2085_v18, %v2084_v55  ;;  %v2274_v32 = vsel %vm2097_vm4, %v2245_v57, 0.0 }
 0x30a   : > { %v2087_v33 = vsel %vm1717_vm3, %v2057_v58, 0.0  ;;  %v2165_v34 = vadd.f32 %v2164_v22, %v2163_v35  ;;  %v2275_v4 = vadd.f32 %v2274_v32, %v2273_v21  ;;  %v2131_v0 = vrot.slane %v3829_v59, 2 }
 0x30b   : > { %v2038_v41 = vrot.slane %v2037_v56, 2  ;;  %v2276_v42 = vsel %vm2097_vm4, %v2246_v27, 0.0  ;;  %v1980_v44 = vrot.slane %v1979_v24, 4  ;;  %v2088_v47 = vadd.f32 %v2087_v33, %v2086_v25 }
 0x30c   : > { %v2166_v43 = vrot.slane %v2165_v34, 4  ;;  %v2227_v3 = vrot.slane %v2226_v6, 2  ;;  %v2277_v49 = vadd.f32 %v2276_v42, %v2275_v4  ;;  %v1946_v46 = vadd.f32 %v1945_v62, %v3728_v52 }
 0x30d   : > { %v1981_v51 = vadd.f32 %v1980_v44, %v1979_v24  ;;  %v2089_v14 = vrot.slane %v2088_v47, 4  ;;  %v2132_v40 = vadd.f32 %v2131_v0, %v3829_v59  ;;  %v2039_v11 = vadd.f32 %v2038_v41, %v2037_v56 }
 0x30e   : > { %v2167_v23 = vadd.f32 %v2166_v43, %v2165_v34  ;;  %v2278_v17 = vrot.slane %v2277_v49, 4  ;;  %v2228_v45 = vadd.f32 %v2227_v3, %v2226_v6  ;;  %v1947_v7 = vrot.slane %v1946_v46, 1 }
 0x30f   : > { %v1982_v39 = vrot.slane %v1981_v51, 2  ;;  %v2090_v8 = vadd.f32 %v2089_v14, %v2088_v47  ;;  %v2133_v60 = vrot.slane %v2132_v40, 1  ;;  %v2040_v59 = vrot.slane %v2039_v11, 1 }
 0x310   : > { %v2168_v61 = vrot.slane %v2167_v23, 2  ;;  %v2279_v12 = vadd.f32 %v2278_v17, %v2277_v49  ;;  %v2229_v38 = vrot.slane %v2228_v45, 1  ;;  %v1948_v2 = vadd.f32 %v1947_v7, %v1946_v46 }
 0x311   : > { %v1983_v30 = vadd.f32 %v1982_v39, %v1981_v51  ;;  %v2091_v31 = vrot.slane %v2090_v8, 2  ;;  %v2134_v13 = vadd.f32 %v2133_v60, %v2132_v40  ;;  %v2041_v54 = vadd.f32 %v2040_v59, %v2039_v11 }
 0x312   : > { %v2169_v63 = vadd.f32 %v2168_v61, %v2167_v23  ;;  %v2280_v52 = vrot.slane %v2279_v12, 2  ;;  %v2230_v36 = vadd.f32 %v2229_v38, %v2228_v45 }
 0x313   : > { %v1984_v62 = vrot.slane %v1983_v30, 1  ;;  %v2092_v1 = vadd.f32 %v2091_v31, %v2090_v8 }
 0x314   : > { %v2170_v53 = vrot.slane %v2169_v63, 1  ;;  %v2281_v10 = vadd.f32 %v2280_v52, %v2279_v12 }
 0x315   : > { %v1985_v56 = vadd.f32 %v1984_v62, %v1983_v30  ;;  %v2093_v5 = vrot.slane %v2092_v1, 1 }
 0x316   : > { %v2171_v16 = vadd.f32 %v2170_v53, %v2169_v63  ;;  %v2282_v29 = vrot.slane %v2281_v10, 1 }
 0x317   : > { %v2094_v50 = vadd.f32 %v2093_v5, %v2092_v1  ;;  %v1986_v28 = vadd.f32 %v1985_v56, %v1948_v2 }
 0x318   : > { %v2172_v58 = vadd.f32 %v2171_v16, %v2134_v13  ;;  %v2283_v9 = vadd.f32 %v2282_v29, %v2281_v10 }
 0x319   : > { %1988 = vst.msk [vmem:[%s586_s25] sm:$0x1] %vm1987_vm5, %v1986_v28  ;;  %v2095_v55 = vadd.f32 %v2094_v50, %v2041_v54 }
 0x31a   : > { %2174 = vrot.lane.b32.xlu0 %v2172_v58, %s3022_s13  ;;  %v2284_v27 = vadd.f32 %v2283_v9, %v2230_v36 }
 0x31b   : > { %2096 = vst.msk [vmem:[%s586_s25 + $0x1] sm:$0x1] %vm1987_vm5, %v2095_v55 }
 0x31c   : > { %2286 = vrot.lane.b32.xlu1 %v2284_v27, %s3022_s13 }
 0x34a   : > { %v1850_v48 = vpop.permute.xlu1 %1849 }
 0x34b   : > { %2699 = vst.msk [vmem:[%s3663_s21 + $0x88] sm:$0xff] %vm1717_vm3, %v1850_v48  ;;  %v1848_v19 = vpop.permute.xlu0 %1847 }
 0x34c   : > { %2698 = vst.msk [vmem:[%s3663_s21 + $0x80] sm:$0xff] %vm1717_vm3, %v1848_v19 }
 0x351   : > { %v1854_v20 = vpop.permute.xlu1 %1853  ;;  %v1852_v15 = vpop.permute.xlu0 %1851 }
 0x352   : > { %2701 = vst.msk [vmem:[%s3663_s21 + $0x98] sm:$0xff] %vm1717_vm3, %v1854_v20  ;;  %2700 = vst.msk [vmem:[%s3663_s21 + $0x90] sm:$0xff] %vm1717_vm3, %v1852_v15 }
 0x355   : > { %v1858_v26 = vpop.permute.xlu1 %1857 }
 0x356   : > { %2703 = vst.msk [vmem:[%s3663_s21 + $0xa8] sm:$0xff] %vm1717_vm3, %v1858_v26 }
 0x358   : > { %v1856_v57 = vpop.permute.xlu0 %1855 }
 0x359   : > { %2702 = vst.msk [vmem:[%s3663_s21 + $0xa0] sm:$0xff] %vm1717_vm3, %v1856_v57 }
 0x35d   : > { %v1862_v21 = vpop.permute.xlu1 %1861 }
 0x35e   : > { %2705 = vst.msk [vmem:[%s3663_s21 + $0xb8] sm:$0xff] %vm1717_vm3, %v1862_v21  ;;  %v1860_v37 = vpop.permute.xlu0 %1859 }
 0x35f   : > { %2704 = vst.msk [vmem:[%s3663_s21 + $0xb0] sm:$0xff] %vm1717_vm3, %v1860_v37 }
 0x363   : > { %v1866_v18 = vpop.permute.xlu1 %1865  ;;  %v1864_v35 = vpop.permute.xlu0 %1863 }
 0x364   : > { %2707 = vst.msk [vmem:[%s3663_s21 + $0xc8] sm:$0xff] %vm1717_vm3, %v1866_v18  ;;  %2706 = vst.msk [vmem:[%s3663_s21 + $0xc0] sm:$0xff] %vm1717_vm3, %v1864_v35 }
 0x36a   : > { %v1870_v6 = vpop.permute.xlu1 %1869 }
 0x36b   : > { %2709 = vst.msk [vmem:[%s3663_s21 + $0xd8] sm:$0xff] %vm1717_vm3, %v1870_v6  ;;  %v1868_v22 = vpop.permute.xlu0 %1867 }
 0x36c   : > { %2708 = vst.msk [vmem:[%s3663_s21 + $0xd0] sm:$0xff] %vm1717_vm3, %v1868_v22 }
 0x370   : > { %v1874_v24 = vpop.permute.xlu1 %1873 }
 0x371   : > { %2711 = vst.msk [vmem:[%s3663_s21 + $0xe8] sm:$0xff] %vm1717_vm3, %v1874_v24 }
 0x372   : > { %v1872_v25 = vpop.permute.xlu0 %1871 }
 0x373   : > { %2710 = vst.msk [vmem:[%s3663_s21 + $0xe0] sm:$0xff] %vm1717_vm3, %v1872_v25 }
 0x376   : > { %v1878_v32 = vpop.permute.xlu1 %1877 }
 0x377   : > { %2713 = vst.msk [vmem:[%s3663_s21 + $0xf8] sm:$0xff] %vm1717_vm3, %v1878_v32 }
 0x379   : > { %v1876_v33 = vpop.permute.xlu0 %1875 }
 0x37a   : > { %2712 = vst.msk [vmem:[%s3663_s21 + $0xf0] sm:$0xff] %vm1717_vm3, %v1876_v33 }
 0x38c   : > { %v2175_v34 = vpop.permute.xlu0 %2174 }
 0x38d   : > { %2177 = vst.msk [vmem:[%s593_s29] sm:$0x1] %vm1987_vm5, %v2175_v34 }
 0x38e   : > { %v2287_v4 = vpop.permute.xlu1 %2286 }
 0x38f   : > { %2289 = vst.msk [vmem:[%s593_s29 + $0x1] sm:$0x1] %vm1987_vm5, %v2287_v4 }
 0x390 PF: > { %s22_s19 = sadd.s32 1, %s3019_s19   ;;  %s3969_s17 = smov %s3015_s18 }
 0x391   : > { %p19_p5 = scmp.ge.s32.totalorder %s22_s19, 4   ;;  %s3970_s18 = smov %s3972_s20 }
 0x393   :  { %21 = sbr.rel (!%p19_p5) target bundleno = 2 (0x2), region = 131 }

// kernel: positionwise_conv_cat.3
= control target key start
LH: loop header
LB: loop body
LE: loop exit
PB: predicated region body
PF: predicated region fallthrough
CT: control target
= control target key end

     0   :  { %10 = vsyncpa [#allocation3], 0  ;;  %s419_s0 = inlined_call_operand.vmem [shape: f32[4], index: 0, kind: input, shape index: {}]   ;;  %s420_s1 = inlined_call_operand.vmem [shape: f32[128,128], index: 1, kind: input, shape index: {}]   ;;  %s421_s2 = inlined_call_operand.vmem [shape: f32[128,128], index: 2, kind: input, shape index: {}]   ;;  %s422_s3 = inlined_call_operand.vmem [shape: f32[128,128], index: 3, kind: output, shape index: {0}]   ;;  %s423_s4 = inlined_call_operand.vmem [shape: f32[128,128], index: 4, kind: output, shape index: {1}]  }
   0x1   :  { %s17_s17 = sshll.u32 %s419_s0, 4  ;;  %s18_s17 = int_to_ptr.vmem [resolvable:$true] %s17_s17 }
   0x2   :  { %s178_s18 = scalar_lea.vmem %s18_s17, 16  ;;  %p183_p1 = scmp.lt.s32.totalorder %s18_s17, %s18_s17 }
   0x3   :  { %p179_p0 = scmp.ne.s32.totalorder %s18_s17, %s178_s18  ;;  %p184_p2 = scmp.lt.s32.totalorder %s178_s18, %s178_s18 }
   0x5   :  { %p185_p3 = por %p184_p2, %p183_p1 }
   0x7   :  { %p186_p4 = pnand %p185_p3, %p179_p0 }
   0x9   :  { %189 = shalt.err (!%p186_p4)
}
   0xa   :  { %s192_s19 = smov [#allocation2]  }
   0xb   :  { %20 = dma.vmem_to_smem %s18_s17, 16, %s192_s19, [#allocation3]  }
   0xc   :  { %190 = dma.done.wait [#allocation3], 16  }
   0xd   :  { %191 = vsyncadd [#allocation3], 4294967280 }
   0xe   :  { %28 = sfence }
   0xf   :  { %s45_s20 = sld [smem:[#allocation2]]  ;;  %s174_s21 = sld [smem:[#allocation2 + $0x1]]  ;;  %v29_v0 = vld [vmem:[%s420_s1] sm:$0xff]  ;;  %v30_v1 = vld [vmem:[%s420_s1 + $0x8] sm:$0xff]  ;;  %v31_v2 = vld [vmem:[%s420_s1 + $0x10] sm:$0xff] }
  0x10   :  { %v32_v3 = vld [vmem:[%s420_s1 + $0x18] sm:$0xff]  ;;  %v33_v4 = vld [vmem:[%s420_s1 + $0x20] sm:$0xff]  ;;  %v34_v5 = vld [vmem:[%s420_s1 + $0x28] sm:$0xff]  ;;  %s251_s15 = sld [smem:[#allocation2 + $0x2]]  ;;  %s253_s16 = sld [smem:[#allocation2 + $0x3]] }
  0x11   :  { %v35_v6 = vld [vmem:[%s420_s1 + $0x30] sm:$0xff]  ;;  %v36_v7 = vld [vmem:[%s420_s1 + $0x38] sm:$0xff]  ;;  %v37_v14 = vld [vmem:[%s420_s1 + $0x40] sm:$0xff] }
  0x12   :  { %v38_v15 = vld [vmem:[%s420_s1 + $0x48] sm:$0xff]  ;;  %v39_v20 = vld [vmem:[%s420_s1 + $0x50] sm:$0xff]  ;;  %v40_v21 = vld [vmem:[%s420_s1 + $0x58] sm:$0xff] }
  0x13   :  { %v41_v22 = vld [vmem:[%s420_s1 + $0x60] sm:$0xff]  ;;  %v42_v27 = vld [vmem:[%s420_s1 + $0x68] sm:$0xff]  ;;  %v43_v28 = vld [vmem:[%s420_s1 + $0x70] sm:$0xff] }
  0x14   :  { %v44_v29 = vld [vmem:[%s420_s1 + $0x78] sm:$0xff]  ;;  %v97_v42 = vld [vmem:[%s421_s2] sm:$0xff]  ;;  %v98_v43 = vld [vmem:[%s421_s2 + $0x8] sm:$0xff] }
  0x15   :  { %v46_v8 = vstv %s45_s20  ;;  %v64_v9 = vstv %s174_s21  ;;  %v99_v48 = vld [vmem:[%s421_s2 + $0x10] sm:$0xff]  ;;  %v100_v49 = vld [vmem:[%s421_s2 + $0x18] sm:$0xff] }
  0x16   :  { %v47_v10 = vsub.f32 %v29_v0, %v46_v8  ;;  %v48_v11 = vsub.f32 %v30_v1, %v46_v8  ;;  %v49_v12 = vsub.f32 %v31_v2, %v46_v8  ;;  %v50_v13 = vsub.f32 %v32_v3, %v46_v8  ;;  %v101_v50 = vld [vmem:[%s421_s2 + $0x20] sm:$0xff]  ;;  %v102_v55 = vld [vmem:[%s421_s2 + $0x28] sm:$0xff]  ;;  %v103_v56 = vld [vmem:[%s421_s2 + $0x30] sm:$0xff] }
  0x17   :  { %v51_v16 = vsub.f32 %v33_v4, %v46_v8  ;;  %v52_v17 = vsub.f32 %v34_v5, %v46_v8  ;;  %v53_v18 = vsub.f32 %v35_v6, %v46_v8  ;;  %v54_v19 = vsub.f32 %v36_v7, %v46_v8  ;;  %v104_v57 = vld [vmem:[%s421_s2 + $0x38] sm:$0xff]  ;;  %v105_v0 = vld [vmem:[%s421_s2 + $0x40] sm:$0xff]  ;;  %v106_v1 = vld [vmem:[%s421_s2 + $0x48] sm:$0xff] }
  0x18   :  { %v65_v23 = vmul.f32 %v64_v9, %v47_v10  ;;  %v66_v24 = vmul.f32 %v64_v9, %v48_v11  ;;  %v67_v25 = vmul.f32 %v64_v9, %v49_v12  ;;  %v68_v26 = vmul.f32 %v64_v9, %v50_v13  ;;  %v107_v6 = vld [vmem:[%s421_s2 + $0x50] sm:$0xff]  ;;  %v108_v7 = vld [vmem:[%s421_s2 + $0x58] sm:$0xff]  ;;  %v110_v13 = vld [vmem:[%s421_s2 + $0x68] sm:$0xff] }
  0x19   :  { %v69_v30 = vmul.f32 %v64_v9, %v51_v16  ;;  %v70_v31 = vmul.f32 %v64_v9, %v52_v17  ;;  %v71_v32 = vmul.f32 %v64_v9, %v53_v18  ;;  %v72_v33 = vmul.f32 %v64_v9, %v54_v19 }
  0x1a   :  { %81 = vst [vmem:[%s422_s3] sm:$0xff] %v65_v23  ;;  %82 = vst [vmem:[%s422_s3 + $0x8] sm:$0xff] %v66_v24  ;;  %v55_v34 = vsub.f32 %v37_v14, %v46_v8  ;;  %v56_v35 = vsub.f32 %v38_v15, %v46_v8  ;;  %v57_v36 = vsub.f32 %v39_v20, %v46_v8  ;;  %v114_v58 = vstv %s251_s15  ;;  %v111_v14 = vld [vmem:[%s421_s2 + $0x70] sm:$0xff] }
  0x1b   :  { %83 = vst [vmem:[%s422_s3 + $0x10] sm:$0xff] %v67_v25  ;;  %84 = vst [vmem:[%s422_s3 + $0x18] sm:$0xff] %v68_v26  ;;  %v58_v37 = vsub.f32 %v40_v21, %v46_v8  ;;  %v59_v38 = vsub.f32 %v41_v22, %v46_v8  ;;  %v60_v39 = vsub.f32 %v42_v27, %v46_v8  ;;  %v132_v59 = vstv %s253_s16  ;;  %v112_v15 = vld [vmem:[%s421_s2 + $0x78] sm:$0xff] }
  0x1c   :  { %85 = vst [vmem:[%s422_s3 + $0x20] sm:$0xff] %v69_v30  ;;  %86 = vst [vmem:[%s422_s3 + $0x28] sm:$0xff] %v70_v31  ;;  %v61_v40 = vsub.f32 %v43_v28, %v46_v8  ;;  %v62_v41 = vsub.f32 %v44_v29, %v46_v8  ;;  %v73_v44 = vmul.f32 %v64_v9, %v55_v34  ;;  %v109_v8 = vld [vmem:[%s421_s2 + $0x60] sm:$0xff] }
  0x1d   :  { %87 = vst [vmem:[%s422_s3 + $0x30] sm:$0xff] %v71_v32  ;;  %88 = vst [vmem:[%s422_s3 + $0x38] sm:$0xff] %v72_v33  ;;  %v74_v45 = vmul.f32 %v64_v9, %v56_v35  ;;  %v75_v46 = vmul.f32 %v64_v9, %v57_v36  ;;  %v76_v47 = vmul.f32 %v64_v9, %v58_v37 }
  0x1e   :  { %v77_v51 = vmul.f32 %v64_v9, %v59_v38  ;;  %v78_v52 = vmul.f32 %v64_v9, %v60_v39  ;;  %v79_v53 = vmul.f32 %v64_v9, %v61_v40  ;;  %v80_v54 = vmul.f32 %v64_v9, %v62_v41  ;;  %89 = vst [vmem:[%s422_s3 + $0x40] sm:$0xff] %v73_v44 }
  0x1f   :  { %90 = vst [vmem:[%s422_s3 + $0x48] sm:$0xff] %v74_v45  ;;  %91 = vst [vmem:[%s422_s3 + $0x50] sm:$0xff] %v75_v46  ;;  %v115_v60 = vsub.f32 %v97_v42, %v114_v58  ;;  %v116_v61 = vsub.f32 %v98_v43, %v114_v58  ;;  %v117_v62 = vsub.f32 %v99_v48, %v114_v58 }
  0x20   :  { %92 = vst [vmem:[%s422_s3 + $0x58] sm:$0xff] %v76_v47  ;;  %93 = vst [vmem:[%s422_s3 + $0x60] sm:$0xff] %v77_v51  ;;  %v118_v63 = vsub.f32 %v100_v49, %v114_v58  ;;  %v119_v2 = vsub.f32 %v101_v50, %v114_v58  ;;  %v120_v3 = vsub.f32 %v102_v55, %v114_v58 }
  0x21   :  { %94 = vst [vmem:[%s422_s3 + $0x68] sm:$0xff] %v78_v52  ;;  %95 = vst [vmem:[%s422_s3 + $0x70] sm:$0xff] %v79_v53  ;;  %v121_v4 = vsub.f32 %v103_v56, %v114_v58  ;;  %v122_v5 = vsub.f32 %v104_v57, %v114_v58  ;;  %v133_v9 = vmul.f32 %v132_v59, %v115_v60 }
  0x22   :  { %96 = vst [vmem:[%s422_s3 + $0x78] sm:$0xff] %v80_v54  ;;  %v134_v10 = vmul.f32 %v132_v59, %v116_v61  ;;  %v135_v11 = vmul.f32 %v132_v59, %v117_v62  ;;  %v136_v12 = vmul.f32 %v132_v59, %v118_v63  ;;  %v137_v16 = vmul.f32 %v132_v59, %v119_v2 }
  0x23   :  { %v138_v17 = vmul.f32 %v132_v59, %v120_v3  ;;  %v139_v18 = vmul.f32 %v132_v59, %v121_v4  ;;  %v140_v19 = vmul.f32 %v132_v59, %v122_v5  ;;  %149 = vst [vmem:[%s423_s4] sm:$0xff] %v133_v9  ;;  %v123_v20 = vsub.f32 %v105_v0, %v114_v58 }
  0x24   :  { %150 = vst [vmem:[%s423_s4 + $0x8] sm:$0xff] %v134_v10  ;;  %151 = vst [vmem:[%s423_s4 + $0x10] sm:$0xff] %v135_v11  ;;  %v124_v21 = vsub.f32 %v106_v1, %v114_v58  ;;  %v125_v22 = vsub.f32 %v107_v6, %v114_v58  ;;  %v126_v23 = vsub.f32 %v108_v7, %v114_v58 }
  0x25   :  { %152 = vst [vmem:[%s423_s4 + $0x18] sm:$0xff] %v136_v12  ;;  %153 = vst [vmem:[%s423_s4 + $0x20] sm:$0xff] %v137_v16  ;;  %v127_v24 = vsub.f32 %v109_v8, %v114_v58  ;;  %v128_v25 = vsub.f32 %v110_v13, %v114_v58  ;;  %v129_v26 = vsub.f32 %v111_v14, %v114_v58 }
  0x26   :  { %154 = vst [vmem:[%s423_s4 + $0x28] sm:$0xff] %v138_v17  ;;  %155 = vst [vmem:[%s423_s4 + $0x30] sm:$0xff] %v139_v18  ;;  %v130_v27 = vsub.f32 %v112_v15, %v114_v58  ;;  %v141_v28 = vmul.f32 %v132_v59, %v123_v20  ;;  %v142_v29 = vmul.f32 %v132_v59, %v124_v21 }
  0x27   :  { %156 = vst [vmem:[%s423_s4 + $0x38] sm:$0xff] %v140_v19  ;;  %v143_v30 = vmul.f32 %v132_v59, %v125_v22  ;;  %v144_v31 = vmul.f32 %v132_v59, %v126_v23  ;;  %v145_v32 = vmul.f32 %v132_v59, %v127_v24  ;;  %v146_v33 = vmul.f32 %v132_v59, %v128_v25 }
  0x28   :  { %v147_v34 = vmul.f32 %v132_v59, %v129_v26  ;;  %v148_v35 = vmul.f32 %v132_v59, %v130_v27  ;;  %157 = vst [vmem:[%s423_s4 + $0x40] sm:$0xff] %v141_v28  ;;  %158 = vst [vmem:[%s423_s4 + $0x48] sm:$0xff] %v142_v29 }
  0x29   :  { %159 = vst [vmem:[%s423_s4 + $0x50] sm:$0xff] %v143_v30  ;;  %160 = vst [vmem:[%s423_s4 + $0x58] sm:$0xff] %v144_v31 }
  0x2a   :  { %161 = vst [vmem:[%s423_s4 + $0x60] sm:$0xff] %v145_v32  ;;  %162 = vst [vmem:[%s423_s4 + $0x68] sm:$0xff] %v146_v33 }
  0x2b   :  { %163 = vst [vmem:[%s423_s4 + $0x70] sm:$0xff] %v147_v34  ;;  %164 = vst [vmem:[%s423_s4 + $0x78] sm:$0xff] %v148_v35 }
  0x2c   :  { %173 = vsyncpa [#allocation3], 1 }

</bundles_post_ra>
